<compile_context>
chip_gen: v7x
topology: tpu7x:2x2x1
jax: 0.10.0
libtpu: 0.0.40
codegen_flags: <defaults>
</compile_context>

<pallas_src>
import functools

import jax
import jax.numpy as jnp
from jax import lax
from jax.experimental import pallas as pl
from jax.experimental.pallas import tpu as pltpu

LANE = 128
SUBLANE = 8


def _round_up(x, m):
    return ((x + m - 1) // m) * m


def invariant_gru_kernel(syn_tok_ref, sem_tok_ref, emb_gates_ref, sem_emb_ref,
                         wh_ref, bh_ref, h0_ref,
                         out_ref, hfin_ref, sem_out_ref,
                         gx_ref, *, H, L):
    f32 = jnp.float32
    Lp, Gp = gx_ref.shape
    Hp = hfin_ref.shape[1]
    V_syn = emb_gates_ref.shape[0]
    L_sem = sem_out_ref.shape[0]
    V_sem = sem_emb_ref.shape[0]

    # --- Semantic embedding lookup as an exact one-hot matmul (tiny vocabulary).
    # TODO(synk): for production vocab sizes keep the tables in HBM (memory_space=pl.ANY) and
    # DMA-gather only the needed rows (scalar-prefetched token ids) instead of one-hot matmuls.
    sem_oh = (lax.broadcasted_iota(jnp.int32, (L_sem, V_sem), 1)
              == sem_tok_ref[...]).astype(f32)                                  # (L_sem, V_sem)
    sem_out_ref[...] = jnp.dot(sem_oh, sem_emb_ref[...], preferred_element_type=f32)

    # --- Folded embedding + input projection + bias: ONE matmul for the whole sequence.
    # emb_gates[v] = embedding[v] @ [W_ir|W_iz|W_in]^T + b_i, gate-packed into Gp lanes.
    syn_oh = (lax.broadcasted_iota(jnp.int32, (Lp, V_syn), 1)
              == syn_tok_ref[...]).astype(f32)               # padded rows (token = -1) -> zero
    gx_ref[...] = jnp.dot(syn_oh, emb_gates_ref[...], preferred_element_type=f32)   # (Lp, Gp)

    # --- Hoist fused recurrent weights / biases / masks out of the serial loop.
    W_h = wh_ref[...]                                        # (Hp, Gp): single MXU column tile
    b_h = bh_ref[...]                                        # (1, Gp)
    lane_mask = lax.broadcasted_iota(jnp.int32, (1, Hp), 1) < H

    def sigmoid_t(x):                                        # one EUP tanh instead of exp+recip
        return 0.5 * (jnp.tanh(0.5 * x) + 1.0)

    def take_gate(x, g):                                     # bring gate g's H lanes to lane 0
        if g == 0:
            return x[:, :Hp]
        return pltpu.roll(x, Gp - g * H, axis=1)[:, :Hp]     # XLU rotate: free slot here

    def gru_step(gx_t, h):
        # TODO(synk): hold W_h in MXU staging registers across steps (pltpu.matmul_push_rhs /
        # matmul_acc_lhs / matmul_pop) once verified against a bundle dump.
        gh = jnp.dot(h, W_h, preferred_element_type=f32) + b_h          # one matmul per step
        s = gx_t + gh                                                   # (1, Gp)
        r = sigmoid_t(take_gate(s, 0))
        z = sigmoid_t(take_gate(s, 1))
        n = jnp.tanh(take_gate(gx_t, 2) + r * take_gate(gh, 2))
        h_new = (1.0 - z) * n + z * h
        return jnp.where(lane_mask, h_new, 0.0)              # keep padded lanes exactly zero

    n_full = L // SUBLANE
    rem = L - n_full * SUBLANE

    def group_body(g, h):
        base = pl.multiple_of(g * SUBLANE, SUBLANE)
        gx_blk = gx_ref[pl.ds(base, SUBLANE), :]             # one aligned (8, Gp) load / group
        rows = []
        for j in range(SUBLANE):                             # unroll capped at 8
            h = gru_step(gx_blk[j:j + 1, :], h)
            rows.append(h)
        out_ref[pl.ds(base, SUBLANE), :] = jnp.concatenate(rows, axis=0)  # one (8, Hp) store
        return h

    h = lax.fori_loop(0, n_full, group_body, h0_ref[...])

    if rem > 0:                                              # static tail (< 8 steps)
        rows = []
        for j in range(rem):
            h = gru_step(gx_ref[pl.ds(n_full * SUBLANE + j, 1), :], h)
            rows.append(h)
        while len(rows) < SUBLANE:                           # rows [L:Lp) are sliced off outside
            rows.append(rows[-1])
        out_ref[pl.ds(Lp - SUBLANE, SUBLANE), :] = jnp.concatenate(rows, axis=0)

    hfin_ref[...] = h


def prepare_invariant_rnn_params(params):
    """One-time weight layout prep (outside the hot path): fold embedding + input projection +
    input bias into a per-token gate table, pack the 3 gates into one 128-lane tile, and
    zero-pad hidden/semantic widths to lane multiples."""
    f32 = jnp.float32
    emb = jnp.asarray(params["embedding"], f32)                   # (V_syn, H)
    sem = jnp.asarray(params["semantic_embedding"], f32)          # (V_sem, S)
    V_syn, H = emb.shape
    V_sem, S = sem.shape
    Hp = _round_up(H, LANE)
    Gp = _round_up(3 * H, LANE)     # all three gates share one lane tile when 3H <= 128
    Sp = _round_up(S, LANE)

    W_i = jnp.split(jnp.asarray(params["weight_ih_l0"], f32), 3, axis=0)   # r, z, n each (H, H)
    W_h = jnp.split(jnp.asarray(params["weight_hh_l0"], f32), 3, axis=0)
    b_i = jnp.split(jnp.asarray(params["bias_ih_l0"], f32), 3)
    b_h = jnp.split(jnp.asarray(params["bias_hh_l0"], f32), 3)

    def pack_w(gates, rows):
        out = jnp.zeros((rows, Gp), f32)
        for g, w in enumerate(gates):
            out = out.at[:H, g * H:(g + 1) * H].set(w.T)
        return out

    def pack_b(gates):
        out = jnp.zeros((1, Gp), f32)
        for g, b in enumerate(gates):
            out = out.at[0, g * H:(g + 1) * H].set(b)
        return out

    # Fold embedding lookup + input projection + input bias (linear composition, exact).
    emb_gates = jnp.dot(emb, pack_w(W_i, H),
                        precision=lax.Precision.HIGHEST) + pack_b(b_i)     # (V_syn, Gp)

    sem_p = jnp.zeros((V_sem, Sp), f32).at[:, :S].set(sem)

    # TODO(synk): optional bf16 storage of emb_gates / W_h (numerics-vs-speed tradeoff).
    return {
        "H": H, "S": S, "Hp": Hp, "Gp": Gp, "Sp": Sp,
        "emb_gates": emb_gates,
        "semantic_embedding": sem_p,
        "W_h": pack_w(W_h, Hp),            # (Hp, Gp), rows [H:Hp) zero
        "b_h": pack_b(b_h),                # (1, Gp)
    }


def invariant_rnn_forward(input_tokens, syntax_tokens, hidden, prepared):
    """Pallas implementation of InvariantRNN.forward (GRU, 1 layer, unidirectional, batch=1).

    input_tokens  : token ids -> semantic embedding output (uses `input.squeeze()` semantics)
    syntax_tokens : token ids -> GRU input (uses `syntax_input.squeeze()` semantics)
    hidden        : (1, 1, H) initial hidden state
    Returns (output (L_syn, 1, H), hidden (1, 1, H), semantics (L_sem, S)) like the module.
    """
    f32 = jnp.float32
    H, S = prepared["H"], prepared["S"]
    Hp, Gp, Sp = prepared["Hp"], prepared["Gp"], prepared["Sp"]

    syn_tok = syntax_tokens.reshape(-1).astype(jnp.int32)      # == syntax_input.squeeze()
    sem_tok = input_tokens.reshape(-1).astype(jnp.int32)       # == input.squeeze()
    L = syn_tok.shape[0]
    L_sem = sem_tok.shape[0]
    Lp = _round_up(L, SUBLANE)

    # Pad sequence to a sublane multiple with an out-of-vocab id (-1 -> all-zero one-hot row).
    syn_tok_p = jnp.full((Lp, 1), -1, jnp.int32).at[:L, 0].set(syn_tok)
    # TODO(synk): pass token ids via SMEM / scalar prefetch (sets up DMA-gather for big vocabs).

    h0_p = jnp.zeros((1, Hp), f32).at[:, :H].set(hidden.reshape(1, H).astype(f32))

    vmem = pl.BlockSpec(memory_space=pltpu.MemorySpace.VMEM)

    out_p, h_fin_p, sem_out_p = pl.pallas_call(
        functools.partial(invariant_gru_kernel, H=H, L=L),
        out_shape=(
            jax.ShapeDtypeStruct((Lp, Hp), f32),
            jax.ShapeDtypeStruct((1, Hp), f32),
            jax.ShapeDtypeStruct((L_sem, Sp), f32),
        ),
        in_specs=[vmem] * 7,
        out_specs=(vmem, vmem, vmem),
        scratch_shapes=[pltpu.VMEM((Lp, Gp), f32)],
    )(
        syn_tok_p,
        sem_tok.reshape(L_sem, 1),
        prepared["emb_gates"], prepared["semantic_embedding"],
        prepared["W_h"], prepared["b_h"],
        h0_p,
    )

    # TODO(synk): batch independent sequences over a leading "parallel" grid axis (fills MXU
    # rows and the 2nd TensorCore on v7x); the module itself is batch=1 by construction.
    # TODO(synk): for very long L, add an "arbitrary" grid axis over sequence chunks with the
    # hidden state carried in a persistent VMEM scratch so gx/out are not fully VMEM-resident.
    output = out_p[:L, :H][:, None, :]            # (L, 1, H) seq-major like torch GRU
    h_fin = h_fin_p[:, :H].reshape(1, 1, H)
    semantics = sem_out_p[:, :S]
    return output, h_fin, semantics


def invariant_rnn_reference(input_tokens, syntax_tokens, hidden, params):
    """Pure-JAX reference matching torch.nn.GRU / nn.Embedding semantics (for verification)."""
    syn_tok = syntax_tokens.reshape(-1)
    sem_tok = input_tokens.reshape(-1)
    H = params["embedding"].shape[1]
    x = params["embedding"][syn_tok]
    sem = params["semantic_embedding"][sem_tok]
    W_ir, W_iz, W_in = jnp.split(params["weight_ih_l0"], 3, axis=0)
    W_hr, W_hz, W_hn = jnp.split(params["weight_hh_l0"], 3, axis=0)
    b_ir, b_iz, b_in = jnp.split(params["bias_ih_l0"], 3)
    b_hr, b_hz, b_hn = jnp.split(params["bias_hh_l0"], 3)

    def step(h, xt):
        r = jax.nn.sigmoid(xt @ W_ir.T + b_ir + h @ W_hr.T + b_hr)
        z = jax.nn.sigmoid(xt @ W_iz.T + b_iz + h @ W_hz.T + b_hz)
        n = jnp.tanh(xt @ W_in.T + b_in + r * (h @ W_hn.T + b_hn))
        h_new = (1.0 - z) * n + z * h
        return h_new, h_new

    h_fin, outs = lax.scan(step, hidden.reshape(H), x)
    return outs[:, None, :], h_fin.reshape(1, 1, H), sem


if __name__ == "__main__":
    # Small shapes consistent with the module's forward: batch=1 (forced by squeeze + [:, None, :]).
    V_syn = 16        # syntax_vocab_size
    V_sem = 20        # semantic_vocab_size
    H = 32            # hidden_size
    S = 24            # semantic_n_hidden (small stand-in for default 120)
    L = 8             # sequence length

    key = jax.random.PRNGKey(0)
    (k_syn_tok, k_sem_tok, k_emb, k_sem,
     k_wih, k_whh, k_bih, k_bhh) = jax.random.split(key, 8)

    bound = 1.0 / (H ** 0.5)
    params = {
        "embedding": jax.random.normal(k_emb, (V_syn, H), jnp.float32),         # nn.Embedding ~ N(0,1)
        "semantic_embedding": jax.random.normal(k_sem, (V_sem, S), jnp.float32),
        "weight_ih_l0": jax.random.uniform(k_wih, (3 * H, H), jnp.float32, -bound, bound),
        "weight_hh_l0": jax.random.uniform(k_whh, (3 * H, H), jnp.float32, -bound, bound),
        "bias_ih_l0": jax.random.uniform(k_bih, (3 * H,), jnp.float32, -bound, bound),
        "bias_hh_l0": jax.random.uniform(k_bhh, (3 * H,), jnp.float32, -bound, bound),
    }

    syntax_tokens = jax.random.randint(k_syn_tok, (1, L), 0, V_syn, dtype=jnp.int32)   # batch x length
    input_tokens = jax.random.randint(k_sem_tok, (1, L), 0, V_sem, dtype=jnp.int32)    # batch x length
    hidden0 = jnp.zeros((1, 1, H), jnp.float32)                                        # init_hidden()

    prepared = prepare_invariant_rnn_params(params)     # one-time layout prep (not per call)

    out, h_fin, sem = invariant_rnn_forward(input_tokens, syntax_tokens, hidden0, prepared)
    jax.block_until_ready((out, h_fin, sem))

    out_r, h_r, sem_r = invariant_rnn_reference(input_tokens, syntax_tokens, hidden0, params)
    assert out.shape == (L, 1, H) and h_fin.shape == (1, 1, H) and sem.shape == (L, S)
    assert jnp.allclose(out, out_r, atol=1e-5, rtol=1e-5)
    assert jnp.allclose(h_fin, h_r, atol=1e-5, rtol=1e-5)
    assert jnp.allclose(sem, sem_r, atol=1e-5, rtol=1e-5)

    print("KERNEL_OK")
</pallas_src>

<mosaic_0001>
module attributes {stable_mosaic.version = 11 : i64} {
  func.func @invariant_gru_kernel(%arg0: memref<8x1xi32, #tpu.memory_space<vmem>>, %arg1: memref<8x1xi32, #tpu.memory_space<vmem>>, %arg2: memref<16x128xf32, #tpu.memory_space<vmem>>, %arg3: memref<20x128xf32, #tpu.memory_space<vmem>>, %arg4: memref<128x128xf32, #tpu.memory_space<vmem>>, %arg5: memref<1x128xf32, #tpu.memory_space<vmem>>, %arg6: memref<1x128xf32, #tpu.memory_space<vmem>>, %arg7: memref<8x128xf32, #tpu.memory_space<vmem>>, %arg8: memref<1x128xf32, #tpu.memory_space<vmem>>, %arg9: memref<8x128xf32, #tpu.memory_space<vmem>>, %arg10: memref<8x128xf32, #tpu.memory_space<vmem>>) attributes {dimension_semantics = [], scalar_prefetch = 0 : i64, scratch_operands = 1 : i64, tpu.core_type = #tpu.core_type<tc>} {
    %0 = tpu.iota {dimensions = array<i32: 1>} : vector<8x20xi32>
    %c0 = arith.constant 0 : index
    %c0_0 = arith.constant 0 : index
    %1 = vector.load %arg1[%c0, %c0_0] : memref<8x1xi32, #tpu.memory_space<vmem>>, vector<8x1xi32>
    %2 = vector.broadcast %1 : vector<8x1xi32> to vector<8x20xi32>
    %3 = arith.cmpi eq, %0, %2 : vector<8x20xi32>
    %4 = arith.extui %3 : vector<8x20xi1> to vector<8x20xi32>
    %5 = arith.sitofp %4 : vector<8x20xi32> to vector<8x20xf32>
    %c0_1 = arith.constant 0 : index
    %c0_2 = arith.constant 0 : index
    %6 = vector.load %arg3[%c0_1, %c0_2] : memref<20x128xf32, #tpu.memory_space<vmem>>, vector<20x128xf32>
    %cst = arith.constant dense<0.000000e+00> : vector<8x128xf32>
    %7 = tpu.matmul %5, %6, %cst {dimension_numbers = #tpu.dot_dimension_numbers<[1], [0], [0], [1], [0, 0, 1, 1], [], []>} : vector<8x20xf32>, vector<20x128xf32>, vector<8x128xf32> -> vector<8x128xf32>
    %c0_3 = arith.constant 0 : index
    %c0_4 = arith.constant 0 : index
    %8 = vector.load %arg9[%c0_3, %c0_4] : memref<8x128xf32, #tpu.memory_space<vmem>>, vector<8x128xf32>
    tpu.vector_store %arg9[%c0_3, %c0_4], %7 {strides = array<i32>} : memref<8x128xf32, #tpu.memory_space<vmem>>, vector<8x128xf32>,
    %9 = tpu.iota {dimensions = array<i32: 1>} : vector<8x16xi32>
    %c0_5 = arith.constant 0 : index
    %c0_6 = arith.constant 0 : index
    %10 = vector.load %arg0[%c0_5, %c0_6] : memref<8x1xi32, #tpu.memory_space<vmem>>, vector<8x1xi32>
    %11 = vector.broadcast %10 : vector<8x1xi32> to vector<8x16xi32>
    %12 = arith.cmpi eq, %9, %11 : vector<8x16xi32>
    %13 = arith.extui %12 : vector<8x16xi1> to vector<8x16xi32>
    %14 = arith.sitofp %13 : vector<8x16xi32> to vector<8x16xf32>
    %c0_7 = arith.constant 0 : index
    %c0_8 = arith.constant 0 : index
    %15 = vector.load %arg2[%c0_7, %c0_8] : memref<16x128xf32, #tpu.memory_space<vmem>>, vector<16x128xf32>
    %cst_9 = arith.constant dense<0.000000e+00> : vector<8x128xf32>
    %16 = tpu.matmul %14, %15, %cst_9 {dimension_numbers = #tpu.dot_dimension_numbers<[1], [0], [0], [1], [0, 0, 1, 1], [], []>} : vector<8x16xf32>, vector<16x128xf32>, vector<8x128xf32> -> vector<8x128xf32>
    %c0_10 = arith.constant 0 : index
    %c0_11 = arith.constant 0 : index
    %17 = vector.load %arg10[%c0_10, %c0_11] : memref<8x128xf32, #tpu.memory_space<vmem>>, vector<8x128xf32>
    tpu.vector_store %arg10[%c0_10, %c0_11], %16 {strides = array<i32>} : memref<8x128xf32, #tpu.memory_space<vmem>>, vector<8x128xf32>,
    %c0_12 = arith.constant 0 : index
    %c0_13 = arith.constant 0 : index
    %18 = vector.load %arg4[%c0_12, %c0_13] : memref<128x128xf32, #tpu.memory_space<vmem>>, vector<128x128xf32>
    %c0_14 = arith.constant 0 : index
    %c0_15 = arith.constant 0 : index
    %19 = vector.load %arg5[%c0_14, %c0_15] : memref<1x128xf32, #tpu.memory_space<vmem>>, vector<1x128xf32>
    %20 = tpu.iota {dimensions = array<i32: 1>} : vector<1x128xi32>
    %c32_i32 = arith.constant 32 : i32
    %21 = vector.broadcast %c32_i32 : i32 to vector<1x128xi32>
    %22 = arith.cmpi slt, %20, %21 : vector<1x128xi32>
    %c0_16 = arith.constant 0 : index
    %c0_17 = arith.constant 0 : index
    %23 = vector.load %arg6[%c0_16, %c0_17] : memref<1x128xf32, #tpu.memory_space<vmem>>, vector<1x128xf32>
    %c0_i32 = arith.constant 0 : i32
    %c8_i32 = arith.constant 8 : i32
    %24 = arith.muli %c0_i32, %c8_i32 : i32
    %25 = tpu.assume_multiple %24, 8 : i32
    %26 = arith.index_cast %25 : i32 to index
    %c0_18 = arith.constant 0 : index
    %27 = vector.load %arg10[%26, %c0_18] : memref<8x128xf32, #tpu.memory_space<vmem>>, vector<8x128xf32>
    %28 = vector.extract_strided_slice %27 {offsets = [0, 0], sizes = [1, 128], strides = [1, 1]} : vector<8x128xf32> to vector<1x128xf32>
    %cst_19 = arith.constant dense<0.000000e+00> : vector<1x128xf32>
    %29 = tpu.matmul %23, %18, %cst_19 {dimension_numbers = #tpu.dot_dimension_numbers<[1], [0], [0], [1], [0, 0, 1, 1], [], []>} : vector<1x128xf32>, vector<128x128xf32>, vector<1x128xf32> -> vector<1x128xf32>
    %30 = arith.addf %29, %19 : vector<1x128xf32>
    %31 = arith.addf %28, %30 : vector<1x128xf32>
    %cst_20 = arith.constant 5.000000e-01 : f32
    %32 = vector.broadcast %cst_20 : f32 to vector<1x128xf32>
    %33 = arith.mulf %32, %31 : vector<1x128xf32>
    %34 = math.tanh %33 : vector<1x128xf32>
    %cst_21 = arith.constant 1.000000e+00 : f32
    %35 = vector.broadcast %cst_21 : f32 to vector<1x128xf32>
    %36 = arith.addf %34, %35 : vector<1x128xf32>
    %cst_22 = arith.constant 5.000000e-01 : f32
    %37 = vector.broadcast %cst_22 : f32 to vector<1x128xf32>
    %38 = arith.mulf %37, %36 : vector<1x128xf32>
    %c96_i32 = arith.constant 96 : i32
    %39 = tpu.dynamic_rotate %31 by %c96_i32 dim 1 : vector<1x128xf32>, i32 -> vector<1x128xf32>
    %cst_23 = arith.constant 5.000000e-01 : f32
    %40 = vector.broadcast %cst_23 : f32 to vector<1x128xf32>
    %41 = arith.mulf %40, %39 : vector<1x128xf32>
    %42 = math.tanh %41 : vector<1x128xf32>
    %cst_24 = arith.constant 1.000000e+00 : f32
    %43 = vector.broadcast %cst_24 : f32 to vector<1x128xf32>
    %44 = arith.addf %42, %43 : vector<1x128xf32>
    %cst_25 = arith.constant 5.000000e-01 : f32
    %45 = vector.broadcast %cst_25 : f32 to vector<1x128xf32>
    %46 = arith.mulf %45, %44 : vector<1x128xf32>
    %c64_i32 = arith.constant 64 : i32
    %47 = tpu.dynamic_rotate %28 by %c64_i32 dim 1 : vector<1x128xf32>, i32 -> vector<1x128xf32>
    %c64_i32_26 = arith.constant 64 : i32
    %48 = tpu.dynamic_rotate %30 by %c64_i32_26 dim 1 : vector<1x128xf32>, i32 -> vector<1x128xf32>
    %49 = arith.mulf %38, %48 : vector<1x128xf32>
    %50 = arith.addf %47, %49 : vector<1x128xf32>
    %51 = math.tanh %50 : vector<1x128xf32>
    %cst_27 = arith.constant 1.000000e+00 : f32
    %52 = vector.broadcast %cst_27 : f32 to vector<1x128xf32>
    %53 = arith.subf %52, %46 : vector<1x128xf32>
    %54 = arith.mulf %53, %51 : vector<1x128xf32>
    %55 = arith.mulf %46, %23 : vector<1x128xf32>
    %56 = arith.addf %54, %55 : vector<1x128xf32>
    %cst_28 = arith.constant 0.000000e+00 : f32
    %57 = vector.broadcast %cst_28 : f32 to vector<1x128xf32>
    %58 = arith.select %22, %56, %57 : vector<1x128xi1>, vector<1x128xf32>
    %59 = vector.extract_strided_slice %27 {offsets = [1, 0], sizes = [1, 128], strides = [1, 1]} : vector<8x128xf32> to vector<1x128xf32>
    %cst_29 = arith.constant dense<0.000000e+00> : vector<1x128xf32>
    %60 = tpu.matmul %58, %18, %cst_29 {dimension_numbers = #tpu.dot_dimension_numbers<[1], [0], [0], [1], [0, 0, 1, 1], [], []>} : vector<1x128xf32>, vector<128x128xf32>, vector<1x128xf32> -> vector<1x128xf32>
    %61 = arith.addf %60, %19 : vector<1x128xf32>
    %62 = arith.addf %59, %61 : vector<1x128xf32>
    %cst_30 = arith.constant 5.000000e-01 : f32
    %63 = vector.broadcast %cst_30 : f32 to vector<1x128xf32>
    %64 = arith.mulf %63, %62 : vector<1x128xf32>
    %65 = math.tanh %64 : vector<1x128xf32>
    %cst_31 = arith.constant 1.000000e+00 : f32
    %66 = vector.broadcast %cst_31 : f32 to vector<1x128xf32>
    %67 = arith.addf %65, %66 : vector<1x128xf32>
    %cst_32 = arith.constant 5.000000e-01 : f32
    %68 = vector.broadcast %cst_32 : f32 to vector<1x128xf32>
    %69 = arith.mulf %68, %67 : vector<1x128xf32>
    %c96_i32_33 = arith.constant 96 : i32
    %70 = tpu.dynamic_rotate %62 by %c96_i32_33 dim 1 : vector<1x128xf32>, i32 -> vector<1x128xf32>
    %cst_34 = arith.constant 5.000000e-01 : f32
    %71 = vector.broadcast %cst_34 : f32 to vector<1x128xf32>
    %72 = arith.mulf %71, %70 : vector<1x128xf32>
    %73 = math.tanh %72 : vector<1x128xf32>
    %cst_35 = arith.constant 1.000000e+00 : f32
    %74 = vector.broadcast %cst_35 : f32 to vector<1x128xf32>
    %75 = arith.addf %73, %74 : vector<1x128xf32>
    %cst_36 = arith.constant 5.000000e-01 : f32
    %76 = vector.broadcast %cst_36 : f32 to vector<1x128xf32>
    %77 = arith.mulf %76, %75 : vector<1x128xf32>
    %c64_i32_37 = arith.constant 64 : i32
    %78 = tpu.dynamic_rotate %59 by %c64_i32_37 dim 1 : vector<1x128xf32>, i32 -> vector<1x128xf32>
    %c64_i32_38 = arith.constant 64 : i32
    %79 = tpu.dynamic_rotate %61 by %c64_i32_38 dim 1 : vector<1x128xf32>, i32 -> vector<1x128xf32>
    %80 = arith.mulf %69, %79 : vector<1x128xf32>
    %81 = arith.addf %78, %80 : vector<1x128xf32>
    %82 = math.tanh %81 : vector<1x128xf32>
    %cst_39 = arith.constant 1.000000e+00 : f32
    %83 = vector.broadcast %cst_39 : f32 to vector<1x128xf32>
    %84 = arith.subf %83, %77 : vector<1x128xf32>
    %85 = arith.mulf %84, %82 : vector<1x128xf32>
    %86 = arith.mulf %77, %58 : vector<1x128xf32>
    %87 = arith.addf %85, %86 : vector<1x128xf32>
    %cst_40 = arith.constant 0.000000e+00 : f32
    %88 = vector.broadcast %cst_40 : f32 to vector<1x128xf32>
    %89 = arith.select %22, %87, %88 : vector<1x128xi1>, vector<1x128xf32>
    %90 = vector.extract_strided_slice %27 {offsets = [2, 0], sizes = [1, 128], strides = [1, 1]} : vector<8x128xf32> to vector<1x128xf32>
    %cst_41 = arith.constant dense<0.000000e+00> : vector<1x128xf32>
    %91 = tpu.matmul %89, %18, %cst_41 {dimension_numbers = #tpu.dot_dimension_numbers<[1], [0], [0], [1], [0, 0, 1, 1], [], []>} : vector<1x128xf32>, vector<128x128xf32>, vector<1x128xf32> -> vector<1x128xf32>
    %92 = arith.addf %91, %19 : vector<1x128xf32>
    %93 = arith.addf %90, %92 : vector<1x128xf32>
    %cst_42 = arith.constant 5.000000e-01 : f32
    %94 = vector.broadcast %cst_42 : f32 to vector<1x128xf32>
    %95 = arith.mulf %94, %93 : vector<1x128xf32>
    %96 = math.tanh %95 : vector<1x128xf32>
    %cst_43 = arith.constant 1.000000e+00 : f32
    %97 = vector.broadcast %cst_43 : f32 to vector<1x128xf32>
    %98 = arith.addf %96, %97 : vector<1x128xf32>
    %cst_44 = arith.constant 5.000000e-01 : f32
    %99 = vector.broadcast %cst_44 : f32 to vector<1x128xf32>
    %100 = arith.mulf %99, %98 : vector<1x128xf32>
    %c96_i32_45 = arith.constant 96 : i32
    %101 = tpu.dynamic_rotate %93 by %c96_i32_45 dim 1 : vector<1x128xf32>, i32 -> vector<1x128xf32>
    %cst_46 = arith.constant 5.000000e-01 : f32
    %102 = vector.broadcast %cst_46 : f32 to vector<1x128xf32>
    %103 = arith.mulf %102, %101 : vector<1x128xf32>
    %104 = math.tanh %103 : vector<1x128xf32>
    %cst_47 = arith.constant 1.000000e+00 : f32
    %105 = vector.broadcast %cst_47 : f32 to vector<1x128xf32>
    %106 = arith.addf %104, %105 : vector<1x128xf32>
    %cst_48 = arith.constant 5.000000e-01 : f32
    %107 = vector.broadcast %cst_48 : f32 to vector<1x128xf32>
    %108 = arith.mulf %107, %106 : vector<1x128xf32>
    %c64_i32_49 = arith.constant 64 : i32
    %109 = tpu.dynamic_rotate %90 by %c64_i32_49 dim 1 : vector<1x128xf32>, i32 -> vector<1x128xf32>
    %c64_i32_50 = arith.constant 64 : i32
    %110 = tpu.dynamic_rotate %92 by %c64_i32_50 dim 1 : vector<1x128xf32>, i32 -> vector<1x128xf32>
    %111 = arith.mulf %100, %110 : vector<1x128xf32>
    %112 = arith.addf %109, %111 : vector<1x128xf32>
    %113 = math.tanh %112 : vector<1x128xf32>
    %cst_51 = arith.constant 1.000000e+00 : f32
    %114 = vector.broadcast %cst_51 : f32 to vector<1x128xf32>
    %115 = arith.subf %114, %108 : vector<1x128xf32>
    %116 = arith.mulf %115, %113 : vector<1x128xf32>
    %117 = arith.mulf %108, %89 : vector<1x128xf32>
    %118 = arith.addf %116, %117 : vector<1x128xf32>
    %cst_52 = arith.constant 0.000000e+00 : f32
    %119 = vector.broadcast %cst_52 : f32 to vector<1x128xf32>
    %120 = arith.select %22, %118, %119 : vector<1x128xi1>, vector<1x128xf32>
    %121 = vector.extract_strided_slice %27 {offsets = [3, 0], sizes = [1, 128], strides = [1, 1]} : vector<8x128xf32> to vector<1x128xf32>
    %cst_53 = arith.constant dense<0.000000e+00> : vector<1x128xf32>
    %122 = tpu.matmul %120, %18, %cst_53 {dimension_numbers = #tpu.dot_dimension_numbers<[1], [0], [0], [1], [0, 0, 1, 1], [], []>} : vector<1x128xf32>, vector<128x128xf32>, vector<1x128xf32> -> vector<1x128xf32>
    %123 = arith.addf %122, %19 : vector<1x128xf32>
    %124 = arith.addf %121, %123 : vector<1x128xf32>
    %cst_54 = arith.constant 5.000000e-01 : f32
    %125 = vector.broadcast %cst_54 : f32 to vector<1x128xf32>
    %126 = arith.mulf %125, %124 : vector<1x128xf32>
    %127 = math.tanh %126 : vector<1x128xf32>
    %cst_55 = arith.constant 1.000000e+00 : f32
    %128 = vector.broadcast %cst_55 : f32 to vector<1x128xf32>
    %129 = arith.addf %127, %128 : vector<1x128xf32>
    %cst_56 = arith.constant 5.000000e-01 : f32
    %130 = vector.broadcast %cst_56 : f32 to vector<1x128xf32>
    %131 = arith.mulf %130, %129 : vector<1x128xf32>
    %c96_i32_57 = arith.constant 96 : i32
    %132 = tpu.dynamic_rotate %124 by %c96_i32_57 dim 1 : vector<1x128xf32>, i32 -> vector<1x128xf32>
    %cst_58 = arith.constant 5.000000e-01 : f32
    %133 = vector.broadcast %cst_58 : f32 to vector<1x128xf32>
    %134 = arith.mulf %133, %132 : vector<1x128xf32>
    %135 = math.tanh %134 : vector<1x128xf32>
    %cst_59 = arith.constant 1.000000e+00 : f32
    %136 = vector.broadcast %cst_59 : f32 to vector<1x128xf32>
    %137 = arith.addf %135, %136 : vector<1x128xf32>
    %cst_60 = arith.constant 5.000000e-01 : f32
    %138 = vector.broadcast %cst_60 : f32 to vector<1x128xf32>
    %139 = arith.mulf %138, %137 : vector<1x128xf32>
    %c64_i32_61 = arith.constant 64 : i32
    %140 = tpu.dynamic_rotate %121 by %c64_i32_61 dim 1 : vector<1x128xf32>, i32 -> vector<1x128xf32>
    %c64_i32_62 = arith.constant 64 : i32
    %141 = tpu.dynamic_rotate %123 by %c64_i32_62 dim 1 : vector<1x128xf32>, i32 -> vector<1x128xf32>
    %142 = arith.mulf %131, %141 : vector<1x128xf32>
    %143 = arith.addf %140, %142 : vector<1x128xf32>
    %144 = math.tanh %143 : vector<1x128xf32>
    %cst_63 = arith.constant 1.000000e+00 : f32
    %145 = vector.broadcast %cst_63 : f32 to vector<1x128xf32>
    %146 = arith.subf %145, %139 : vector<1x128xf32>
    %147 = arith.mulf %146, %144 : vector<1x128xf32>
    %148 = arith.mulf %139, %120 : vector<1x128xf32>
    %149 = arith.addf %147, %148 : vector<1x128xf32>
    %cst_64 = arith.constant 0.000000e+00 : f32
    %150 = vector.broadcast %cst_64 : f32 to vector<1x128xf32>
    %151 = arith.select %22, %149, %150 : vector<1x128xi1>, vector<1x128xf32>
    %152 = vector.extract_strided_slice %27 {offsets = [4, 0], sizes = [1, 128], strides = [1, 1]} : vector<8x128xf32> to vector<1x128xf32>
    %cst_65 = arith.constant dense<0.000000e+00> : vector<1x128xf32>
    %153 = tpu.matmul %151, %18, %cst_65 {dimension_numbers = #tpu.dot_dimension_numbers<[1], [0], [0], [1], [0, 0, 1, 1], [], []>} : vector<1x128xf32>, vector<128x128xf32>, vector<1x128xf32> -> vector<1x128xf32>
    %154 = arith.addf %153, %19 : vector<1x128xf32>
    %155 = arith.addf %152, %154 : vector<1x128xf32>
    %cst_66 = arith.constant 5.000000e-01 : f32
    %156 = vector.broadcast %cst_66 : f32 to vector<1x128xf32>
    %157 = arith.mulf %156, %155 : vector<1x128xf32>
    %158 = math.tanh %157 : vector<1x128xf32>
    %cst_67 = arith.constant 1.000000e+00 : f32
    %159 = vector.broadcast %cst_67 : f32 to vector<1x128xf32>
    %160 = arith.addf %158, %159 : vector<1x128xf32>
    %cst_68 = arith.constant 5.000000e-01 : f32
    %161 = vector.broadcast %cst_68 : f32 to vector<1x128xf32>
    %162 = arith.mulf %161, %160 : vector<1x128xf32>
    %c96_i32_69 = arith.constant 96 : i32
    %163 = tpu.dynamic_rotate %155 by %c96_i32_69 dim 1 : vector<1x128xf32>, i32 -> vector<1x128xf32>
    %cst_70 = arith.constant 5.000000e-01 : f32
    %164 = vector.broadcast %cst_70 : f32 to vector<1x128xf32>
    %165 = arith.mulf %164, %163 : vector<1x128xf32>
    %166 = math.tanh %165 : vector<1x128xf32>
    %cst_71 = arith.constant 1.000000e+00 : f32
    %167 = vector.broadcast %cst_71 : f32 to vector<1x128xf32>
    %168 = arith.addf %166, %167 : vector<1x128xf32>
    %cst_72 = arith.constant 5.000000e-01 : f32
    %169 = vector.broadcast %cst_72 : f32 to vector<1x128xf32>
    %170 = arith.mulf %169, %168 : vector<1x128xf32>
    %c64_i32_73 = arith.constant 64 : i32
    %171 = tpu.dynamic_rotate %152 by %c64_i32_73 dim 1 : vector<1x128xf32>, i32 -> vector<1x128xf32>
    %c64_i32_74 = arith.constant 64 : i32
    %172 = tpu.dynamic_rotate %154 by %c64_i32_74 dim 1 : vector<1x128xf32>, i32 -> vector<1x128xf32>
    %173 = arith.mulf %162, %172 : vector<1x128xf32>
    %174 = arith.addf %171, %173 : vector<1x128xf32>
    %175 = math.tanh %174 : vector<1x128xf32>
    %cst_75 = arith.constant 1.000000e+00 : f32
    %176 = vector.broadcast %cst_75 : f32 to vector<1x128xf32>
    %177 = arith.subf %176, %170 : vector<1x128xf32>
    %178 = arith.mulf %177, %175 : vector<1x128xf32>
    %179 = arith.mulf %170, %151 : vector<1x128xf32>
    %180 = arith.addf %178, %179 : vector<1x128xf32>
    %cst_76 = arith.constant 0.000000e+00 : f32
    %181 = vector.broadcast %cst_76 : f32 to vector<1x128xf32>
    %182 = arith.select %22, %180, %181 : vector<1x128xi1>, vector<1x128xf32>
    %183 = vector.extract_strided_slice %27 {offsets = [5, 0], sizes = [1, 128], strides = [1, 1]} : vector<8x128xf32> to vector<1x128xf32>
    %cst_77 = arith.constant dense<0.000000e+00> : vector<1x128xf32>
    %184 = tpu.matmul %182, %18, %cst_77 {dimension_numbers = #tpu.dot_dimension_numbers<[1], [0], [0], [1], [0, 0, 1, 1], [], []>} : vector<1x128xf32>, vector<128x128xf32>, vector<1x128xf32> -> vector<1x128xf32>
    %185 = arith.addf %184, %19 : vector<1x128xf32>
    %186 = arith.addf %183, %185 : vector<1x128xf32>
    %cst_78 = arith.constant 5.000000e-01 : f32
    %187 = vector.broadcast %cst_78 : f32 to vector<1x128xf32>
    %188 = arith.mulf %187, %186 : vector<1x128xf32>
    %189 = math.tanh %188 : vector<1x128xf32>
    %cst_79 = arith.constant 1.000000e+00 : f32
    %190 = vector.broadcast %cst_79 : f32 to vector<1x128xf32>
    %191 = arith.addf %189, %190 : vector<1x128xf32>
    %cst_80 = arith.constant 5.000000e-01 : f32
    %192 = vector.broadcast %cst_80 : f32 to vector<1x128xf32>
    %193 = arith.mulf %192, %191 : vector<1x128xf32>
    %c96_i32_81 = arith.constant 96 : i32
    %194 = tpu.dynamic_rotate %186 by %c96_i32_81 dim 1 : vector<1x128xf32>, i32 -> vector<1x128xf32>
    %cst_82 = arith.constant 5.000000e-01 : f32
    %195 = vector.broadcast %cst_82 : f32 to vector<1x128xf32>
    %196 = arith.mulf %195, %194 : vector<1x128xf32>
    %197 = math.tanh %196 : vector<1x128xf32>
    %cst_83 = arith.constant 1.000000e+00 : f32
    %198 = vector.broadcast %cst_83 : f32 to vector<1x128xf32>
    %199 = arith.addf %197, %198 : vector<1x128xf32>
    %cst_84 = arith.constant 5.000000e-01 : f32
    %200 = vector.broadcast %cst_84 : f32 to vector<1x128xf32>
    %201 = arith.mulf %200, %199 : vector<1x128xf32>
    %c64_i32_85 = arith.constant 64 : i32
    %202 = tpu.dynamic_rotate %183 by %c64_i32_85 dim 1 : vector<1x128xf32>, i32 -> vector<1x128xf32>
    %c64_i32_86 = arith.constant 64 : i32
    %203 = tpu.dynamic_rotate %185 by %c64_i32_86 dim 1 : vector<1x128xf32>, i32 -> vector<1x128xf32>
    %204 = arith.mulf %193, %203 : vector<1x128xf32>
    %205 = arith.addf %202, %204 : vector<1x128xf32>
    %206 = math.tanh %205 : vector<1x128xf32>
    %cst_87 = arith.constant 1.000000e+00 : f32
    %207 = vector.broadcast %cst_87 : f32 to vector<1x128xf32>
    %208 = arith.subf %207, %201 : vector<1x128xf32>
    %209 = arith.mulf %208, %206 : vector<1x128xf32>
    %210 = arith.mulf %201, %182 : vector<1x128xf32>
    %211 = arith.addf %209, %210 : vector<1x128xf32>
    %cst_88 = arith.constant 0.000000e+00 : f32
    %212 = vector.broadcast %cst_88 : f32 to vector<1x128xf32>
    %213 = arith.select %22, %211, %212 : vector<1x128xi1>, vector<1x128xf32>
    %214 = vector.extract_strided_slice %27 {offsets = [6, 0], sizes = [1, 128], strides = [1, 1]} : vector<8x128xf32> to vector<1x128xf32>
    %cst_89 = arith.constant dense<0.000000e+00> : vector<1x128xf32>
    %215 = tpu.matmul %213, %18, %cst_89 {dimension_numbers = #tpu.dot_dimension_numbers<[1], [0], [0], [1], [0, 0, 1, 1], [], []>} : vector<1x128xf32>, vector<128x128xf32>, vector<1x128xf32> -> vector<1x128xf32>
    %216 = arith.addf %215, %19 : vector<1x128xf32>
    %217 = arith.addf %214, %216 : vector<1x128xf32>
    %cst_90 = arith.constant 5.000000e-01 : f32
    %218 = vector.broadcast %cst_90 : f32 to vector<1x128xf32>
    %219 = arith.mulf %218, %217 : vector<1x128xf32>
    %220 = math.tanh %219 : vector<1x128xf32>
    %cst_91 = arith.constant 1.000000e+00 : f32
    %221 = vector.broadcast %cst_91 : f32 to vector<1x128xf32>
    %222 = arith.addf %220, %221 : vector<1x128xf32>
    %cst_92 = arith.constant 5.000000e-01 : f32
    %223 = vector.broadcast %cst_92 : f32 to vector<1x128xf32>
    %224 = arith.mulf %223, %222 : vector<1x128xf32>
    %c96_i32_93 = arith.constant 96 : i32
    %225 = tpu.dynamic_rotate %217 by %c96_i32_93 dim 1 : vector<1x128xf32>, i32 -> vector<1x128xf32>
    %cst_94 = arith.constant 5.000000e-01 : f32
    %226 = vector.broadcast %cst_94 : f32 to vector<1x128xf32>
    %227 = arith.mulf %226, %225 : vector<1x128xf32>
    %228 = math.tanh %227 : vector<1x128xf32>
    %cst_95 = arith.constant 1.000000e+00 : f32
    %229 = vector.broadcast %cst_95 : f32 to vector<1x128xf32>
    %230 = arith.addf %228, %229 : vector<1x128xf32>
    %cst_96 = arith.constant 5.000000e-01 : f32
    %231 = vector.broadcast %cst_96 : f32 to vector<1x128xf32>
    %232 = arith.mulf %231, %230 : vector<1x128xf32>
    %c64_i32_97 = arith.constant 64 : i32
    %233 = tpu.dynamic_rotate %214 by %c64_i32_97 dim 1 : vector<1x128xf32>, i32 -> vector<1x128xf32>
    %c64_i32_98 = arith.constant 64 : i32
    %234 = tpu.dynamic_rotate %216 by %c64_i32_98 dim 1 : vector<1x128xf32>, i32 -> vector<1x128xf32>
    %235 = arith.mulf %224, %234 : vector<1x128xf32>
    %236 = arith.addf %233, %235 : vector<1x128xf32>
    %237 = math.tanh %236 : vector<1x128xf32>
    %cst_99 = arith.constant 1.000000e+00 : f32
    %238 = vector.broadcast %cst_99 : f32 to vector<1x128xf32>
    %239 = arith.subf %238, %232 : vector<1x128xf32>
    %240 = arith.mulf %239, %237 : vector<1x128xf32>
    %241 = arith.mulf %232, %213 : vector<1x128xf32>
    %242 = arith.addf %240, %241 : vector<1x128xf32>
    %cst_100 = arith.constant 0.000000e+00 : f32
    %243 = vector.broadcast %cst_100 : f32 to vector<1x128xf32>
    %244 = arith.select %22, %242, %243 : vector<1x128xi1>, vector<1x128xf32>
    %245 = vector.extract_strided_slice %27 {offsets = [7, 0], sizes = [1, 128], strides = [1, 1]} : vector<8x128xf32> to vector<1x128xf32>
    %cst_101 = arith.constant dense<0.000000e+00> : vector<1x128xf32>
    %246 = tpu.matmul %244, %18, %cst_101 {dimension_numbers = #tpu.dot_dimension_numbers<[1], [0], [0], [1], [0, 0, 1, 1], [], []>} : vector<1x128xf32>, vector<128x128xf32>, vector<1x128xf32> -> vector<1x128xf32>
    %247 = arith.addf %246, %19 : vector<1x128xf32>
    %248 = arith.addf %245, %247 : vector<1x128xf32>
    %cst_102 = arith.constant 5.000000e-01 : f32
    %249 = vector.broadcast %cst_102 : f32 to vector<1x128xf32>
    %250 = arith.mulf %249, %248 : vector<1x128xf32>
    %251 = math.tanh %250 : vector<1x128xf32>
    %cst_103 = arith.constant 1.000000e+00 : f32
    %252 = vector.broadcast %cst_103 : f32 to vector<1x128xf32>
    %253 = arith.addf %251, %252 : vector<1x128xf32>
    %cst_104 = arith.constant 5.000000e-01 : f32
    %254 = vector.broadcast %cst_104 : f32 to vector<1x128xf32>
    %255 = arith.mulf %254, %253 : vector<1x128xf32>
    %c96_i32_105 = arith.constant 96 : i32
    %256 = tpu.dynamic_rotate %248 by %c96_i32_105 dim 1 : vector<1x128xf32>, i32 -> vector<1x128xf32>
    %cst_106 = arith.constant 5.000000e-01 : f32
    %257 = vector.broadcast %cst_106 : f32 to vector<1x128xf32>
    %258 = arith.mulf %257, %256 : vector<1x128xf32>
    %259 = math.tanh %258 : vector<1x128xf32>
    %cst_107 = arith.constant 1.000000e+00 : f32
    %260 = vector.broadcast %cst_107 : f32 to vector<1x128xf32>
    %261 = arith.addf %259, %260 : vector<1x128xf32>
    %cst_108 = arith.constant 5.000000e-01 : f32
    %262 = vector.broadcast %cst_108 : f32 to vector<1x128xf32>
    %263 = arith.mulf %262, %261 : vector<1x128xf32>
    %c64_i32_109 = arith.constant 64 : i32
    %264 = tpu.dynamic_rotate %245 by %c64_i32_109 dim 1 : vector<1x128xf32>, i32 -> vector<1x128xf32>
    %c64_i32_110 = arith.constant 64 : i32
    %265 = tpu.dynamic_rotate %247 by %c64_i32_110 dim 1 : vector<1x128xf32>, i32 -> vector<1x128xf32>
    %266 = arith.mulf %255, %265 : vector<1x128xf32>
    %267 = arith.addf %264, %266 : vector<1x128xf32>
    %268 = math.tanh %267 : vector<1x128xf32>
    %cst_111 = arith.constant 1.000000e+00 : f32
    %269 = vector.broadcast %cst_111 : f32 to vector<1x128xf32>
    %270 = arith.subf %269, %263 : vector<1x128xf32>
    %271 = arith.mulf %270, %268 : vector<1x128xf32>
    %272 = arith.mulf %263, %244 : vector<1x128xf32>
    %273 = arith.addf %271, %272 : vector<1x128xf32>
    %cst_112 = arith.constant 0.000000e+00 : f32
    %274 = vector.broadcast %cst_112 : f32 to vector<1x128xf32>
    %275 = arith.select %22, %273, %274 : vector<1x128xi1>, vector<1x128xf32>
    %276 = tpu.concatenate %58, %89, %120, %151, %182, %213, %244, %275 in 0 : vector<1x128xf32>, vector<1x128xf32>, vector<1x128xf32>, vector<1x128xf32>, vector<1x128xf32>, vector<1x128xf32>, vector<1x128xf32>, vector<1x128xf32> -> vector<8x128xf32>
    %277 = arith.index_cast %25 : i32 to index
    %c0_113 = arith.constant 0 : index
    %278 = vector.load %arg7[%277, %c0_113] : memref<8x128xf32, #tpu.memory_space<vmem>>, vector<8x128xf32>
    tpu.vector_store %arg7[%277, %c0_113], %276 {strides = array<i32>} : memref<8x128xf32, #tpu.memory_space<vmem>>, vector<8x128xf32>,
    %c1_i32 = arith.constant 1 : i32
    %c0_114 = arith.constant 0 : index
    %c0_115 = arith.constant 0 : index
    %279 = vector.load %arg8[%c0_114, %c0_115] : memref<1x128xf32, #tpu.memory_space<vmem>>, vector<1x128xf32>
    tpu.vector_store %arg8[%c0_114, %c0_115], %275 {strides = array<i32>} : memref<1x128xf32, #tpu.memory_space<vmem>>, vector<1x128xf32>,
    return
  }
}

</mosaic_0001>

<bundles_post_ra>
// kernel: tpu_custom_call.1
= control target key start
LH: loop header
LB: loop body
LE: loop exit
PB: predicated region body
PF: predicated region fallthrough
CT: control target
= control target key end

     0   :  { %15 = vsyncpa [#allocation4], 0  ;;  %s2438_s0 = inlined_call_operand.vmem [shape: s32[8,1], index: 0, kind: input, shape index: {}]   ;;  %s2439_s1 = inlined_call_operand.vmem [shape: s32[8,1], index: 1, kind: input, shape index: {}]   ;;  %s2440_s2 = inlined_call_operand.hbm [shape: f32[16,128], index: 2, kind: input, shape index: {}]   ;;  %s2441_s3 = inlined_call_operand.vmem [shape: f32[20,128], index: 3, kind: input, shape index: {}]   ;;  %s2442_s4 = inlined_call_operand.hbm [shape: f32[128,128], index: 4, kind: input, shape index: {}]   ;;  %s2443_s5 = inlined_call_operand.vmem [shape: f32[1,128], index: 5, kind: input, shape index: {}]   ;;  %s2444_s6 = inlined_call_operand.vmem [shape: f32[1,128], index: 6, kind: input, shape index: {}]   ;;  %s2445_s7 = inlined_call_operand.hbm [shape: f32[8,128], index: 7, kind: output, shape index: {0}]   ;;  %s2446_s8 = inlined_call_operand.hbm [shape: f32[1,128], index: 8, kind: output, shape index: {1}]   ;;  %s2447_s9 = inlined_call_operand.hbm [shape: f32[8,128], index: 9, kind: output, shape index: {2}]  }
   0x1   :  { %16 = vsyncpa [#allocation7], 0 }
   0x2   :  { %17 = vsyncpa [#allocation5], 0 }
   0x3   :  { %18 = vsyncpa [#allocation10], 0  ;;  %s2005_s30 = smov [#allocation3]   ;;  %s1887_s13 = scalar_lea.hbm %s2440_s2, 256 }
   0x4   :  { %s28_s10 = sshll.u32 %s2005_s30, 4  ;;  %p1888_p0 = scmp.ne.s32.totalorder %s2440_s2, %s1887_s13  ;;  %s29_s10 = int_to_ptr.vmem [resolvable:$true] %s28_s10 }
   0x5   :  { %p1891_p1 = scmp.lt.u32.totalorder %s1887_s13, %s2440_s2 }
   0x7   :  { %p1893_p2 = pnand %p1891_p1, %p1888_p0 }
   0x9   :  { %1896 = shalt.err (!%p1893_p2)
}
   0xa   :  { %s1897_s18 = scalar_lea.vmem %s29_s10, 256  ;;  %p1902_p4 = scmp.lt.s32.totalorder %s29_s10, %s29_s10 }
   0xb   :  { %p1898_p3 = scmp.ne.s32.totalorder %s29_s10, %s1897_s18  ;;  %p1903_p5 = scmp.lt.s32.totalorder %s1897_s18, %s1897_s18 }
   0xd   :  { %p1904_p6 = por %p1903_p5, %p1902_p4 }
   0xf   :  { %p1905_p7 = pnand %p1904_p6, %p1898_p3 }
  0x11   :  { %1908 = shalt.err (!%p1905_p7)
}
  0x12   :  { %s2006_s19 = smov 128   ;;  %s2007_s20 = smov 8  }
  0x13   :  { %34 = dma.hbm_to_vmem [thread:$0]  %s2440_s2, 256, %s29_s10, [#allocation4], %s2006_s19, %s2006_s19, %s2007_s20  }
  0x14   :  { %s2008_s23 = smov [#allocation6]   ;;  %s1909_s27 = scalar_lea.hbm %s2442_s4, 2048 }
  0x15   :  { %s42_s24 = sshll.u32 %s2008_s23, 4  ;;  %p1910_p8 = scmp.ne.s32.totalorder %s2442_s4, %s1909_s27  ;;  %s43_s24 = int_to_ptr.vmem [resolvable:$true] %s42_s24 }
  0x16   :  { %p1913_p9 = scmp.lt.u32.totalorder %s1909_s27, %s2442_s4 }
  0x18   :  { %p1915_p10 = pnand %p1913_p9, %p1910_p8 }
  0x1a   :  { %1918 = shalt.err (!%p1915_p10)
}
  0x1b   :  { %s1919_s12 = scalar_lea.vmem %s43_s24, 2048  ;;  %p1924_p12 = scmp.lt.s32.totalorder %s43_s24, %s43_s24 }
  0x1c   :  { %p1920_p11 = scmp.ne.s32.totalorder %s43_s24, %s1919_s12  ;;  %p1925_p13 = scmp.lt.s32.totalorder %s1919_s12, %s1919_s12 }
  0x1e   :  { %p1926_p0 = por %p1925_p13, %p1924_p12 }
  0x20   :  { %p1927_p1 = pnand %p1926_p0, %p1920_p11 }
  0x22   :  { %1930 = shalt.err (!%p1927_p1)
}
  0x23   :  { %48 = dma.hbm_to_vmem [thread:$0]  %s2442_s4, 2048, %s43_s24, [#allocation7], %s2006_s19, %s2006_s19, %s2007_s20  }
  0x24   :  { %1997 = dma.done.wait [#allocation4], 256  }
  0x25   :  { %1998 = vsyncadd [#allocation4], 4294967040 }
  0x26   :  { %1999 = dma.done.wait [#allocation7], 2048  }
  0x27   :  { %2000 = vsyncadd [#allocation7], 4294965248  ;;  %v2009_v0 = vmov 0   ;;  %v2010_v1 = vmov 0.0|0.0   ;;  %v150_v2 = vld [vmem:[%s2438_s0] sm:$0xff]  ;;  %v158_v4 = vld [vmem:[#allocation3 + $0x8] sm:$0xff]  ;;  %v59_v12 = vlaneseq }
  0x28   :  { %1838 = vset.pattern.permute.xlu0 %v2009_v0  ;;  %1630 = vmatprep.subr.bf16.mxu1 %v2010_v1  ;;  %v157_v3 = vld [vmem:[#allocation3] sm:$0xff]  ;;  %v69_v6 = vld [vmem:[%s2441_s3 + $0x8] sm:$0xff]  ;;  %vm2011_vm0 = vmmov 0   ;;  %v2012_v10 = vmov 0.0   ;;  %v70_v11 = vld [vmem:[%s2441_s3 + $0x10] sm:$0xf] }
  0x29   :  { %1627 = vmatprep.subr.bf16.mxu0 %v2010_v1  ;;  %152 = vperm.xlu0 %1838, %v150_v2   ;;  %v68_v5 = vld [vmem:[%s2441_s3] sm:$0xff]  ;;  %v1631_v8 = vpack.c.bf16 %v158_v4, %v157_v3  ;;  %vm75_vm1 = vcmask 1043456   ;;  %v2117_v13 = vand.u32 127, %v59_v12  ;;  %v234_v14 = vld [vmem:[#allocation6] sm:$0xff]  ;;  %v235_v15 = vld [vmem:[#allocation6 + $0x8] sm:$0xff]  ;;  %vm159_vm2 = vcmask 130048  }
  0x2a   :  { %v61_v7 = vld [vmem:[%s2439_s1] sm:$0xff]  ;;  %v1628_v9 = vpack.c.bf16 %v69_v6, %v68_v5  ;;  %1344 = vmatprep.mubr.msk.f32.mxu1 %vm2011_vm0, %v2012_v10  ;;  %1337 = vmatprep.mubr.msk.f32.mxu0 %vm2011_vm0, %v2012_v10  ;;  %v2119_v17 = vpack.c.bf16 %v235_v15, %v234_v14  ;;  %v237_v19 = vld [vmem:[#allocation6 + $0x18] sm:$0xff]  ;;  %vm71_vm4 = vcmask 162816   ;;  %v238_v23 = vld [vmem:[#allocation6 + $0x20] sm:$0xff]  ;;  %s2014_s23 = smov 96   ;;  %vm1118_vm7 = vcmask 1040384  }
  0x2b   :  { %1632 = vmatpush3.bf16.msra.mxu1 %v1631_v8  ;;  %v236_v18 = vld [vmem:[#allocation6 + $0x10] sm:$0xff]  ;;  %v239_v24 = vld [vmem:[#allocation6 + $0x28] sm:$0xff]  ;;  %v241_v28 = vld [vmem:[#allocation6 + $0x38] sm:$0xff]  ;;  %vm251_vm6 = vcmp.lt.s32.totalorder %v2117_v13, 32  ;;  %vm1120_vm8 = vcmask 1041408   ;;  %vm1122_vm9 = vcmask 1042432  }
  0x2c   :  { %1629 = vmatpush3.bf16.msra.mxu0 %v1628_v9  ;;  %1633 = vmatprep.subr.bf16.mxu1 %v2010_v1  ;;  %v2124_v22 = vpack.c.bf16 %v237_v19, %v236_v18  ;;  %v2132_v26 = vpack.c.bf16 %v239_v24, %v238_v23  ;;  %v240_v27 = vld [vmem:[#allocation6 + $0x30] sm:$0xff]  ;;  %v242_v30 = vld [vmem:[#allocation6 + $0x40] sm:$0xff]  ;;  %v243_v31 = vld [vmem:[#allocation6 + $0x48] sm:$0xff]  ;;  %vm1125_vm10 = vcmask 1044480   ;;  %vm1127_vm11 = vcmask 1045504   ;;  %s2016_s25 = smov [#allocation11]  }
  0x2d   :  { %63 = vperm.xlu0 %1838, %v61_v7   ;;  %1335 = vmatprep.subr.mxu0 %v2012_v10  ;;  %v2140_v29 = vpack.c.bf16 %v241_v28, %v240_v27  ;;  %v2146_v32 = vpack.c.bf16 %v243_v31, %v242_v30  ;;  %v244_v33 = vld [vmem:[#allocation6 + $0x50] sm:$0xff]  ;;  %v245_v34 = vld [vmem:[#allocation6 + $0x58] sm:$0xff]  ;;  %v246_v36 = vld [vmem:[#allocation6 + $0x60] sm:$0xff]  ;;  %s1159_s26 = sshll.u32 %s2016_s25, 4  ;;  %s2017_s27 = smov [#allocation8]   ;;  %vm1129_vm12 = vcmask 1046528   ;;  %s2387_s26 = int_to_ptr.vmem [resolvable:$true] %s1159_s26 }
  0x2e   :  { %v2152_v35 = vpack.c.bf16 %v245_v34, %v244_v33  ;;  %v247_v37 = vld [vmem:[#allocation6 + $0x68] sm:$0xff]  ;;  %v248_v39 = vld [vmem:[#allocation6 + $0x70] sm:$0xff]  ;;  %v249_v40 = vld [vmem:[#allocation6 + $0x78] sm:$0xff]  ;;  %s1139_s28 = sshll.u32 %s2017_s27, 4  ;;  %s2389_s28 = int_to_ptr.vmem [resolvable:$true] %s1139_s28 }
  0x2f   :  { %v2158_v38 = vpack.c.bf16 %v247_v37, %v246_v36  ;;  %v2164_v41 = vpack.c.bf16 %v249_v40, %v248_v39  ;;  %v252_v42 = vld [vmem:[%s2444_s6] sm:$0x1]  ;;  %s2013_s6 = smov 64  }
  0x30   :  { %1336 = vmatpush3.msk.msra.mxu0 %vm75_vm1, %v70_v11  ;;  %v2203_v47 = vld [vmem:[%s2443_s5] sm:$0x1]  ;;  %s2015_s5 = smov [#allocation9]  }
  0x31   :  { %1657 = vmatprep.subr.bf16.mxu0 %v2010_v1  ;;  %s1149_s24 = sshll.u32 %s2015_s5, 4  ;;  %s1150_s24 = int_to_ptr.vmem [resolvable:$true] %s1149_s24 }
  0x32   :  { %s1931_s29 = scalar_lea.vmem %s1150_s24, 16  ;;  %s1935_s30 = scalar_lea.vmem %s1150_s24, 32 }
  0x33   :  { %p1932_p2 = scmp.ne.s32.totalorder %s1150_s24, %s1931_s29  ;;  %p1936_p3 = scmp.lt.s32.totalorder %s1150_s24, %s1150_s24 }
  0x34   :  { %p1937_p4 = scmp.lt.s32.totalorder %s1935_s30, %s1931_s29 }
  0x36   :  { %p1938_p5 = por %p1937_p4, %p1936_p3 }
  0x38   :  { %p1939_p6 = pnand %p1938_p5, %p1932_p2 }
  0xa8   :  { %v153_v16 = vpop.permute.xlu0 %152 }
  0xa9   :  { %vm154_vm3 = vcmp.eq.s32.totalorder %v2117_v13, %v153_v16 }
  0xaa   :  { %v1179_v20 = vsel %vm154_vm3, 1.0, %v2012_v10 }
  0xab   :  { %1345 = vmatmul.mubr.msk.f32.vlgmr.msra.gmra.mrb[0].mxu1 %vm159_vm2, %v1179_v20 }
  0xac   :  { %1635 = vmatpush3.bf16.msra.mxu1 %v2119_v17  ;;  %v64_v21 = vpop.permute.xlu0 %63  ;;  %1379 = vmatprep.mubr.msk.f32.mxu1 %vm2011_vm0, %v2012_v10 }
  0xad   :  { %vm65_vm5 = vcmp.eq.s32.totalorder %v2117_v13, %v64_v21  ;;  %1636 = vmatprep.subr.bf16.mxu1 %v2010_v1 }
  0xae   :  { %v1176_v25 = vsel %vm65_vm5, 1.0, %v2012_v10 }
  0xaf   :  { %1338 = vmatmul.mubr.msk.f32.vlgmr.msra.gmra.mrb[0].mxu0 %vm71_vm4, %v1176_v25 }
  0xb0   :  { %1638 = vmatpush3.bf16.msra.mxu1 %v2124_v22  ;;  %1659 = vmatpush3.bf16.msra.mxu0 %v2119_v17 }
  0xb1   :  { %1639 = vmatprep.subr.bf16.mxu1 %v2010_v1  ;;  %1660 = vmatprep.subr.bf16.mxu0 %v2010_v1 }
  0xb2   :  { %1414 = vmatprep.mubr.msk.f32.mxu0 %vm2011_vm0, %v2012_v10 }
  0xb4   :  { %1641 = vmatpush3.bf16.msra.mxu1 %v2132_v26  ;;  %1662 = vmatpush3.bf16.msra.mxu0 %v2124_v22 }
  0xb5   :  { %1642 = vmatprep.subr.bf16.mxu1 %v2010_v1  ;;  %1663 = vmatprep.subr.bf16.mxu0 %v2010_v1 }
  0xb8   :  { %1644 = vmatpush3.bf16.msra.mxu1 %v2140_v29  ;;  %1665 = vmatpush3.bf16.msra.mxu0 %v2132_v26 }
  0xb9   :  { %1645 = vmatprep.subr.bf16.mxu1 %v2010_v1  ;;  %1666 = vmatprep.subr.bf16.mxu0 %v2010_v1 }
  0xbc   :  { %1647 = vmatpush3.bf16.msra.mxu1 %v2146_v32  ;;  %1668 = vmatpush3.bf16.msra.mxu0 %v2140_v29 }
  0xbd   :  { %1648 = vmatprep.subr.bf16.mxu1 %v2010_v1  ;;  %1669 = vmatprep.subr.bf16.mxu0 %v2010_v1 }
  0xc0   :  { %1650 = vmatpush3.bf16.msra.mxu1 %v2152_v35  ;;  %1671 = vmatpush3.bf16.msra.mxu0 %v2146_v32 }
  0xc1   :  { %1651 = vmatprep.subr.bf16.mxu1 %v2010_v1  ;;  %1672 = vmatprep.subr.bf16.mxu0 %v2010_v1 }
  0xc4   :  { %1653 = vmatpush3.bf16.msra.mxu1 %v2158_v38  ;;  %1674 = vmatpush3.bf16.msra.mxu0 %v2152_v35 }
  0xc5   :  { %1654 = vmatprep.subr.bf16.mxu1 %v2010_v1  ;;  %1675 = vmatprep.subr.bf16.mxu0 %v2010_v1 }
  0xc8   :  { %1656 = vmatpush3.bf16.msra.mxu1 %v2164_v41  ;;  %1677 = vmatpush3.bf16.msra.mxu0 %v2158_v38 }
  0xc9   :  { %1678 = vmatprep.subr.bf16.mxu0 %v2010_v1  ;;  %1681 = vmatprep.subr.bf16.mxu1 %v2010_v1 }
  0xcb   :  { %1380 = vmatmul.mubr.f32.vlgmr.msra.gmra.mrb[2].mxu1 %v252_v42 }
  0xcc   :  { %1680 = vmatpush3.bf16.msra.mxu0 %v2164_v41  ;;  %1683 = vmatpush3.bf16.msra.mxu1 %v2119_v17 }
  0xcd   :  { %1684 = vmatprep.subr.bf16.mxu1 %v2010_v1  ;;  %1449 = vmatprep.mubr.msk.f32.mxu1 %vm2011_vm0, %v2012_v10 }
  0xce   :  { %1705 = vmatprep.subr.bf16.mxu0 %v2010_v1 }
  0xd0   :  { %1686 = vmatpush3.bf16.msra.mxu1 %v2124_v22 }
  0xd1   :  { %1687 = vmatprep.subr.bf16.mxu1 %v2010_v1 }
  0xd4   :  { %1689 = vmatpush3.bf16.msra.mxu1 %v2132_v26 }
  0xd5   :  { %1690 = vmatprep.subr.bf16.mxu1 %v2010_v1 }
  0xd8   :  { %1692 = vmatpush3.bf16.msra.mxu1 %v2140_v29 }
  0xd9   :  { %1693 = vmatprep.subr.bf16.mxu1 %v2010_v1 }
  0xdc   :  { %1695 = vmatpush3.bf16.msra.mxu1 %v2146_v32 }
  0xdd   :  { %1696 = vmatprep.subr.bf16.mxu1 %v2010_v1 }
  0xe0   :  { %1698 = vmatpush3.bf16.msra.mxu1 %v2152_v35 }
  0xe1   :  { %1699 = vmatprep.subr.bf16.mxu1 %v2010_v1 }
  0xe4   :  { %1701 = vmatpush3.bf16.msra.mxu1 %v2158_v38 }
  0xe5   :  { %1702 = vmatprep.subr.bf16.mxu1 %v2010_v1 }
  0xe8   :  { %1704 = vmatpush3.bf16.msra.mxu1 %v2164_v41 }
  0xe9   :  { %1729 = vmatprep.subr.bf16.mxu1 %v2010_v1 }
 0x17e   :  { %v2196_v43 = vpop.f32.mrb[0].mxu1 }
 0x17f   :  { %v1346_v44 = vpop.f32.mrb[1].mxu1  ;;  %335 = vrot.lane.b32.xlu0 %v2196_v43, %s2013_s6  ;;  %v435_v15 = vrot.slane %v2196_v43, 1 }
 0x182   :  { %v145_v45 = vpop.f32.mrb[0].mxu0 }
 0x183   :  { %149 = vst [vmem:[#allocation11] sm:$0xff] %v145_v45  ;;  %v1339_v46 = vpop.f32.mrb[1].mxu0 }
 0x19e   :  { %v320_v48 = vpop.f32.mrb[2].mxu1 }
 0x19f   :  { %v321_v49 = vadd.f32 %v320_v48, %v2203_v47  ;;  %v1381_v50 = vpop.f32.mrb[3].mxu1 }
 0x1a1   :  { %v324_v51 = vadd.f32 %v321_v49, %v2196_v43 }
 0x1a3   :  { %329 = vrot.lane.b32.xlu1 %v324_v51, %s2014_s23  ;;  %v325_v52 = vmul.f32 0.5, %v324_v51 }
 0x1a5   :  { %1839 = vtanh.f32 %v325_v52 }
 0x1a7   :  { %337 = vrot.lane.b32.xlu1 %v321_v49, %s2013_s6 }
 0x1af   :  { %v1840_v53 = vpop.eup %1839 }
 0x1b0   :  { %v327_v54 = vadd.f32 1.0, %v1840_v53  ;;  %v542_v53 = vrot.slane %v2196_v43, 2 }
 0x1b2   :  { %v328_v57 = vmul.f32 0.5, %v327_v54 }
 0x1f1   :  { %v336_v60 = vpop.permute.xlu0 %335 }
 0x215   :  { %v330_v55 = vpop.permute.xlu1 %329 }
 0x216   :  { %v331_v56 = vmul.f32 0.5, %v330_v55 }
 0x218   :  { %1841 = vtanh.f32 %v331_v56 }
 0x219   :  { %v338_v58 = vpop.permute.xlu1 %337 }
 0x21a   :  { %v339_v59 = vmul.f32 %v338_v58, %v328_v57 }
 0x21c   :  { %v340_v61 = vadd.f32 %v339_v59, %v336_v60 }
 0x21e   :  { %1843 = vtanh.f32 %v340_v61 }
 0x222   :  { %v1842_v62 = vpop.eup %1841 }
 0x223   :  { %v333_v63 = vadd.f32 1.0, %v1842_v62 }
 0x225   :  { %v334_v0 = vmul.f32 0.5, %v333_v63 }
 0x227   :  { %v342_v2 = vsub.f32 1.0, %v334_v0  ;;  %v344_v4 = vmul.f32 %v334_v0, %v252_v42 }
 0x228   :  { %v1844_v3 = vpop.eup %1843 }
 0x229   :  { %v343_v5 = vmul.f32 %v1844_v3, %v342_v2 }
 0x22b   :  { %v345_v6 = vadd.f32 %v344_v4, %v343_v5 }
 0x22d   :  { %1415 = vmatmul.mubr.msk.f32.vlgmr.msra.gmra.mrb[2].mxu0 %vm251_vm6, %v345_v6  ;;  %v2238_v40 = vsel %vm251_vm6, %v345_v6, 0.0 }
 0x22e   :  { %1707 = vmatpush3.bf16.msra.mxu0 %v2119_v17  ;;  %1484 = vmatprep.mubr.msk.f32.mxu0 %vm2011_vm0, %v2012_v10 }
 0x22f   :  { %1708 = vmatprep.subr.bf16.mxu0 %v2010_v1 }
 0x232   :  { %1710 = vmatpush3.bf16.msra.mxu0 %v2124_v22 }
 0x233   :  { %1711 = vmatprep.subr.bf16.mxu0 %v2010_v1 }
 0x236   :  { %1713 = vmatpush3.bf16.msra.mxu0 %v2132_v26 }
 0x237   :  { %1714 = vmatprep.subr.bf16.mxu0 %v2010_v1 }
 0x23a   :  { %1716 = vmatpush3.bf16.msra.mxu0 %v2140_v29 }
 0x23b   :  { %1717 = vmatprep.subr.bf16.mxu0 %v2010_v1 }
 0x23e   :  { %1719 = vmatpush3.bf16.msra.mxu0 %v2146_v32 }
 0x23f   :  { %1720 = vmatprep.subr.bf16.mxu0 %v2010_v1 }
 0x242   :  { %1722 = vmatpush3.bf16.msra.mxu0 %v2152_v35 }
 0x243   :  { %1723 = vmatprep.subr.bf16.mxu0 %v2010_v1 }
 0x246   :  { %1725 = vmatpush3.bf16.msra.mxu0 %v2158_v38 }
 0x247   :  { %1726 = vmatprep.subr.bf16.mxu0 %v2010_v1 }
 0x24a   :  { %1728 = vmatpush3.bf16.msra.mxu0 %v2164_v41 }
 0x24b   :  { %1753 = vmatprep.subr.bf16.mxu0 %v2010_v1 }
 0x300   :  { %v413_v7 = vpop.f32.mrb[2].mxu0 }
 0x301   :  { %v414_v8 = vadd.f32 %v413_v7, %v2203_v47  ;;  %v1416_v9 = vpop.f32.mrb[3].mxu0 }
 0x303   :  { %v418_v11 = vrot.slane %v414_v8, 7  ;;  %439 = vrot.lane.b32.xlu0 %v414_v8, %s2013_s6 }
 0x305   :  { %v420_v12 = vadd.f32 %v418_v11, %v2196_v43 }
 0x307   :  { %v426_v14 = vrot.slane %v420_v12, 1  ;;  %v421_v16 = vmul.f32 0.5, %v420_v12 }
 0x309   :  { %428 = vrot.lane.b32.xlu1 %v426_v14, %s2014_s23  ;;  %1845 = vtanh.f32 %v421_v16 }
 0x30d   :  { %437 = vrot.lane.b32.xlu1 %v435_v15, %s2013_s6 }
 0x313   :  { %v1846_v18 = vpop.eup %1845 }
 0x314   :  { %v423_v19 = vadd.f32 1.0, %v1846_v18 }
 0x316   :  { %v424_v23 = vmul.f32 0.5, %v423_v19 }
 0x375   :  { %v440_v20 = vpop.permute.xlu0 %439 }
 0x376   :  { %v442_v21 = vrot.slane %v440_v20, 7 }
 0x378   :  { %v444_v24 = vmul.f32 %v442_v21, %v424_v23  ;;  %v649_v21 = vrot.slane %v2196_v43, 3 }
 0x37a   :  { %v446_v28 = vrot.slane %v444_v24, 1 }
 0x37b   :  { %v429_v25 = vpop.permute.xlu1 %428 }
 0x37c   :  { %v430_v27 = vmul.f32 0.5, %v429_v25 }
 0x37e   :  { %1847 = vtanh.f32 %v430_v27 }
 0x37f   :  { %v438_v30 = vpop.permute.xlu1 %437 }
 0x380   :  { %v448_v31 = vadd.f32 %v446_v28, %v438_v30 }
 0x382   :  { %1849 = vtanh.f32 %v448_v31 }
 0x388   :  { %v1848_v33 = vpop.eup %1847 }
 0x389   :  { %v432_v34 = vadd.f32 1.0, %v1848_v33 }
 0x38b   :  { %v433_v36 = vmul.f32 0.5, %v432_v34 }
 0x38c   :  { %v1850_v39 = vpop.eup %1849 }
 0x38d   :  { %v450_v37 = vsub.f32 1.0, %v433_v36  ;;  %v452_v42 = vmul.f32 %v433_v36, %v2238_v40 }
 0x38f   :  { %v451_v44 = vmul.f32 %v1850_v39, %v450_v37 }
 0x391   :  { %v453_v45 = vadd.f32 %v452_v42, %v451_v44 }
 0x393   :  { %1450 = vmatmul.mubr.msk.f32.vlgmr.msra.gmra.mrb[4].mxu1 %vm251_vm6, %v453_v45  ;;  %v2269_v8 = vsel %vm251_vm6, %v453_v45, 0.0 }
 0x394   :  { %1731 = vmatpush3.bf16.msra.mxu1 %v2119_v17  ;;  %1519 = vmatprep.mubr.msk.f32.mxu1 %vm2011_vm0, %v2012_v10 }
 0x395   :  { %1732 = vmatprep.subr.bf16.mxu1 %v2010_v1 }
 0x398   :  { %1734 = vmatpush3.bf16.msra.mxu1 %v2124_v22 }
 0x399   :  { %1735 = vmatprep.subr.bf16.mxu1 %v2010_v1 }
 0x39c   :  { %1737 = vmatpush3.bf16.msra.mxu1 %v2132_v26 }
 0x39d   :  { %1738 = vmatprep.subr.bf16.mxu1 %v2010_v1 }
 0x3a0   :  { %1740 = vmatpush3.bf16.msra.mxu1 %v2140_v29 }
 0x3a1   :  { %1741 = vmatprep.subr.bf16.mxu1 %v2010_v1 }
 0x3a4   :  { %1743 = vmatpush3.bf16.msra.mxu1 %v2146_v32 }
 0x3a5   :  { %1744 = vmatprep.subr.bf16.mxu1 %v2010_v1 }
 0x3a8   :  { %1746 = vmatpush3.bf16.msra.mxu1 %v2152_v35 }
 0x3a9   :  { %1747 = vmatprep.subr.bf16.mxu1 %v2010_v1 }
 0x3ac   :  { %1749 = vmatpush3.bf16.msra.mxu1 %v2158_v38 }
 0x3ad   :  { %1750 = vmatprep.subr.bf16.mxu1 %v2010_v1 }
 0x3b0   :  { %1752 = vmatpush3.bf16.msra.mxu1 %v2164_v41 }
 0x3b1   :  { %1777 = vmatprep.subr.bf16.mxu1 %v2010_v1 }
 0x466   :  { %v521_v46 = vpop.f32.mrb[4].mxu1 }
 0x467   :  { %v522_v48 = vadd.f32 %v521_v46, %v2203_v47  ;;  %v1451_v49 = vpop.f32.mrb[5].mxu1 }
 0x469   :  { %v526_v50 = vrot.slane %v522_v48, 6  ;;  %546 = vrot.lane.b32.xlu1 %v522_v48, %s2013_s6 }
 0x46b   :  { %v528_v51 = vadd.f32 %v526_v50, %v2196_v43 }
 0x46d   :  { %v534_v52 = vrot.slane %v528_v51, 2  ;;  %v529_v54 = vmul.f32 0.5, %v528_v51 }
 0x46f   :  { %536 = vrot.lane.b32.xlu0 %v534_v52, %s2014_s23  ;;  %1851 = vtanh.f32 %v529_v54 }
 0x473   :  { %544 = vrot.lane.b32.xlu0 %v542_v53, %s2013_s6 }
 0x479   :  { %v1852_v55 = vpop.eup %1851 }
 0x47a   :  { %v531_v56 = vadd.f32 1.0, %v1852_v55 }
 0x47c   :  { %v532_v59 = vmul.f32 0.5, %v531_v56 }
 0x4db   :  { %v547_v57 = vpop.permute.xlu1 %546 }
 0x4dc   :  { %v549_v58 = vrot.slane %v547_v57, 6 }
 0x4de   :  { %v551_v60 = vmul.f32 %v549_v58, %v532_v59  ;;  %v756_v59 = vrot.slane %v2196_v43, 4 }
 0x4e0   :  { %v553_v63 = vrot.slane %v551_v60, 2 }
 0x4e1   :  { %v537_v61 = vpop.permute.xlu0 %536 }
 0x4e2   :  { %v538_v62 = vmul.f32 0.5, %v537_v61 }
 0x4e4   :  { %1853 = vtanh.f32 %v538_v62 }
 0x4e5   :  { %v545_v0 = vpop.permute.xlu0 %544 }
 0x4e6   :  { %v555_v2 = vadd.f32 %v553_v63, %v545_v0 }
 0x4e8   :  { %1855 = vtanh.f32 %v555_v2 }
 0x4ee   :  { %v1854_v3 = vpop.eup %1853 }
 0x4ef   :  { %v540_v4 = vadd.f32 1.0, %v1854_v3 }
 0x4f1   :  { %v541_v5 = vmul.f32 0.5, %v540_v4 }
 0x4f2   :  { %v1856_v7 = vpop.eup %1855 }
 0x4f3   :  { %v557_v6 = vsub.f32 1.0, %v541_v5  ;;  %v559_v9 = vmul.f32 %v541_v5, %v2269_v8 }
 0x4f5   :  { %v558_v11 = vmul.f32 %v1856_v7, %v557_v6 }
 0x4f7   :  { %v560_v12 = vadd.f32 %v559_v9, %v558_v11 }
 0x4f9   :  { %1485 = vmatmul.mubr.msk.f32.vlgmr.msra.gmra.mrb[4].mxu0 %vm251_vm6, %v560_v12  ;;  %v2300_v49 = vsel %vm251_vm6, %v560_v12, 0.0 }
 0x4fa   :  { %1755 = vmatpush3.bf16.msra.mxu0 %v2119_v17  ;;  %1554 = vmatprep.mubr.msk.f32.mxu0 %vm2011_vm0, %v2012_v10 }
 0x4fb   :  { %1756 = vmatprep.subr.bf16.mxu0 %v2010_v1 }
 0x4fe   :  { %1758 = vmatpush3.bf16.msra.mxu0 %v2124_v22 }
 0x4ff   :  { %1759 = vmatprep.subr.bf16.mxu0 %v2010_v1 }
 0x502   :  { %1761 = vmatpush3.bf16.msra.mxu0 %v2132_v26 }
 0x503   :  { %1762 = vmatprep.subr.bf16.mxu0 %v2010_v1 }
 0x506   :  { %1764 = vmatpush3.bf16.msra.mxu0 %v2140_v29 }
 0x507   :  { %1765 = vmatprep.subr.bf16.mxu0 %v2010_v1 }
 0x50a   :  { %1767 = vmatpush3.bf16.msra.mxu0 %v2146_v32 }
 0x50b   :  { %1768 = vmatprep.subr.bf16.mxu0 %v2010_v1 }
 0x50e   :  { %1770 = vmatpush3.bf16.msra.mxu0 %v2152_v35 }
 0x50f   :  { %1771 = vmatprep.subr.bf16.mxu0 %v2010_v1 }
 0x512   :  { %1773 = vmatpush3.bf16.msra.mxu0 %v2158_v38 }
 0x513   :  { %1774 = vmatprep.subr.bf16.mxu0 %v2010_v1 }
 0x516   :  { %1776 = vmatpush3.bf16.msra.mxu0 %v2164_v41 }
 0x517   :  { %1801 = vmatprep.subr.bf16.mxu0 %v2010_v1 }
 0x5cc   :  { %v628_v14 = vpop.f32.mrb[4].mxu0 }
 0x5cd   :  { %v629_v15 = vadd.f32 %v628_v14, %v2203_v47  ;;  %v1486_v16 = vpop.f32.mrb[5].mxu0 }
 0x5cf   :  { %v633_v18 = vrot.slane %v629_v15, 5  ;;  %653 = vrot.lane.b32.xlu0 %v629_v15, %s2013_s6 }
 0x5d1   :  { %v635_v19 = vadd.f32 %v633_v18, %v2196_v43 }
 0x5d3   :  { %v641_v20 = vrot.slane %v635_v19, 3  ;;  %v636_v23 = vmul.f32 0.5, %v635_v19 }
 0x5d5   :  { %643 = vrot.lane.b32.xlu1 %v641_v20, %s2014_s23  ;;  %1857 = vtanh.f32 %v636_v23 }
 0x5d9   :  { %651 = vrot.lane.b32.xlu1 %v649_v21, %s2013_s6 }
 0x5df   :  { %v1858_v24 = vpop.eup %1857 }
 0x5e0   :  { %v638_v25 = vadd.f32 1.0, %v1858_v24 }
 0x5e2   :  { %v639_v30 = vmul.f32 0.5, %v638_v25 }
 0x641   :  { %v654_v27 = vpop.permute.xlu0 %653 }
 0x642   :  { %v656_v28 = vrot.slane %v654_v27, 5 }
 0x644   :  { %v658_v31 = vmul.f32 %v656_v28, %v639_v30 }
 0x646   :  { %v660_v36 = vrot.slane %v658_v31, 3 }
 0x647   :  { %v644_v33 = vpop.permute.xlu1 %643 }
 0x648   :  { %v645_v34 = vmul.f32 0.5, %v644_v33 }
 0x64a   :  { %1859 = vtanh.f32 %v645_v34 }
 0x64b   :  { %v652_v37 = vpop.permute.xlu1 %651 }
 0x64c   :  { %v662_v39 = vadd.f32 %v660_v36, %v652_v37 }
 0x64e   :  { %1861 = vtanh.f32 %v662_v39 }
 0x654   :  { %v1860_v42 = vpop.eup %1859 }
 0x655   :  { %v647_v44 = vadd.f32 1.0, %v1860_v42 }
 0x657   :  { %v648_v45 = vmul.f32 0.5, %v647_v44 }
 0x658   :  { %v1862_v48 = vpop.eup %1861 }
 0x659   :  { %v664_v46 = vsub.f32 1.0, %v648_v45  ;;  %v666_v50 = vmul.f32 %v648_v45, %v2300_v49 }
 0x65b   :  { %v665_v51 = vmul.f32 %v1862_v48, %v664_v46 }
 0x65d   :  { %v667_v52 = vadd.f32 %v666_v50, %v665_v51 }
 0x65f   :  { %1520 = vmatmul.mubr.msk.f32.vlgmr.msra.gmra.mrb[6].mxu1 %vm251_vm6, %v667_v52  ;;  %v2330_v18 = vsel %vm251_vm6, %v667_v52, 0.0 }
 0x660   :  { %1779 = vmatpush3.bf16.msra.mxu1 %v2119_v17  ;;  %1589 = vmatprep.mubr.msk.f32.mxu1 %vm2011_vm0, %v2012_v10 }
 0x661   :  { %1780 = vmatprep.subr.bf16.mxu1 %v2010_v1 }
 0x664   :  { %1782 = vmatpush3.bf16.msra.mxu1 %v2124_v22 }
 0x665   :  { %1783 = vmatprep.subr.bf16.mxu1 %v2010_v1 }
 0x668   :  { %1785 = vmatpush3.bf16.msra.mxu1 %v2132_v26 }
 0x669   :  { %1786 = vmatprep.subr.bf16.mxu1 %v2010_v1 }
 0x66c   :  { %1788 = vmatpush3.bf16.msra.mxu1 %v2140_v29 }
 0x66d   :  { %1789 = vmatprep.subr.bf16.mxu1 %v2010_v1 }
 0x670   :  { %1791 = vmatpush3.bf16.msra.mxu1 %v2146_v32 }
 0x671   :  { %1792 = vmatprep.subr.bf16.mxu1 %v2010_v1 }
 0x674   :  { %1794 = vmatpush3.bf16.msra.mxu1 %v2152_v35 }
 0x675   :  { %1795 = vmatprep.subr.bf16.mxu1 %v2010_v1 }
 0x678   :  { %1797 = vmatpush3.bf16.msra.mxu1 %v2158_v38 }
 0x679   :  { %1798 = vmatprep.subr.bf16.mxu1 %v2010_v1 }
 0x67c   :  { %1800 = vmatpush3.bf16.msra.mxu1 %v2164_v41 }
 0x732   :  { %v735_v53 = vpop.f32.mrb[6].mxu1 }
 0x733   :  { %v736_v54 = vadd.f32 %v735_v53, %v2203_v47  ;;  %v1521_v55 = vpop.f32.mrb[7].mxu1 }
 0x735   :  { %v740_v56 = vrot.slane %v736_v54, 4  ;;  %760 = vrot.lane.b32.xlu1 %v736_v54, %s2013_s6 }
 0x737   :  { %v742_v57 = vadd.f32 %v740_v56, %v2196_v43 }
 0x739   :  { %v748_v58 = vrot.slane %v742_v57, 4  ;;  %v743_v60 = vmul.f32 0.5, %v742_v57  ;;  %v970_v57 = vrot.slane %v2196_v43, 6 }
 0x73b   :  { %750 = vrot.lane.b32.xlu0 %v748_v58, %s2014_s23  ;;  %1863 = vtanh.f32 %v743_v60 }
 0x73f   :  { %758 = vrot.lane.b32.xlu0 %v756_v59, %s2013_s6 }
 0x745   :  { %v1864_v61 = vpop.eup %1863 }
 0x746   :  { %v745_v62 = vadd.f32 1.0, %v1864_v61 }
 0x748   :  { %v746_v2 = vmul.f32 0.5, %v745_v62 }
 0x7a7   :  { %v761_v63 = vpop.permute.xlu1 %760 }
 0x7a8   :  { %v763_v0 = vrot.slane %v761_v63, 4 }
 0x7aa   :  { %v765_v3 = vmul.f32 %v763_v0, %v746_v2 }
 0x7ac   :  { %v767_v6 = vrot.slane %v765_v3, 4 }
 0x7ad   :  { %v751_v4 = vpop.permute.xlu0 %750 }
 0x7ae   :  { %v752_v5 = vmul.f32 0.5, %v751_v4 }
 0x7b0   :  { %1865 = vtanh.f32 %v752_v5 }
 0x7b1   :  { %v759_v7 = vpop.permute.xlu0 %758 }
 0x7b2   :  { %v769_v9 = vadd.f32 %v767_v6, %v759_v7 }
 0x7b4   :  { %1867 = vtanh.f32 %v769_v9 }
 0x7ba   :  { %v1866_v11 = vpop.eup %1865 }
 0x7bb   :  { %v754_v12 = vadd.f32 1.0, %v1866_v11 }
 0x7bd   :  { %v755_v14 = vmul.f32 0.5, %v754_v12  ;;  %v1098_v12 = vrot.slane %v2269_v8, 7 }
 0x7be   :  { %v1868_v16 = vpop.eup %1867 }
 0x7bf   :  { %v771_v15 = vsub.f32 1.0, %v755_v14  ;;  %v773_v19 = vmul.f32 %v755_v14, %v2330_v18 }
 0x7c1   :  { %v772_v20 = vmul.f32 %v1868_v16, %v771_v15  ;;  %v1101_v16 = vrot.slane %v2300_v49, 6 }
 0x7c3   :  { %v774_v21 = vadd.f32 %v773_v19, %v772_v20  ;;  %v1104_v20 = vrot.slane %v2330_v18, 5 }
 0x7c5   :  { %1555 = vmatmul.mubr.msk.f32.vlgmr.msra.gmra.mrb[6].mxu0 %vm251_vm6, %v774_v21  ;;  %v775_v45 = vsel %vm251_vm6, %v774_v21, 0.0 }
 0x7c6   :  { %1803 = vmatpush3.bf16.msra.mxu0 %v2119_v17  ;;  %1624 = vmatprep.mubr.msk.f32.mxu0 %vm2011_vm0, %v2012_v10 }
 0x7c7   :  { %1804 = vmatprep.subr.bf16.mxu0 %v2010_v1 }
 0x7ca   :  { %1806 = vmatpush3.bf16.msra.mxu0 %v2124_v22 }
 0x7cb   :  { %1807 = vmatprep.subr.bf16.mxu0 %v2010_v1 }
 0x7ce   :  { %1809 = vmatpush3.bf16.msra.mxu0 %v2132_v26 }
 0x7cf   :  { %1810 = vmatprep.subr.bf16.mxu0 %v2010_v1 }
 0x7d2   :  { %1812 = vmatpush3.bf16.msra.mxu0 %v2140_v29 }
 0x7d3   :  { %1813 = vmatprep.subr.bf16.mxu0 %v2010_v1 }
 0x7d6   :  { %1815 = vmatpush3.bf16.msra.mxu0 %v2146_v32 }
 0x7d7   :  { %1816 = vmatprep.subr.bf16.mxu0 %v2010_v1 }
 0x7da   :  { %1818 = vmatpush3.bf16.msra.mxu0 %v2152_v35  ;;  %v863_v35 = vrot.slane %v2196_v43, 5 }
 0x7db   :  { %1819 = vmatprep.subr.bf16.mxu0 %v2010_v1 }
 0x7de   :  { %1821 = vmatpush3.bf16.msra.mxu0 %v2158_v38 }
 0x7df   :  { %1822 = vmatprep.subr.bf16.mxu0 %v2010_v1 }
 0x7e2   :  { %1824 = vmatpush3.bf16.msra.mxu0 %v2164_v41 }
 0x898   :  { %v842_v10 = vpop.f32.mrb[6].mxu0 }
 0x899   :  { %v843_v17 = vadd.f32 %v842_v10, %v2203_v47  ;;  %v1556_v22 = vpop.f32.mrb[7].mxu0 }
 0x89a   :  { %v1119_v22 = vsel %vm1118_vm7, %v2238_v40, %v1098_v12 }
 0x89b   :  { %v847_v26 = vrot.slane %v843_v17, 3  ;;  %867 = vrot.lane.b32.xlu0 %v843_v17, %s2013_s6  ;;  %v1107_v17 = vrot.slane %v775_v45, 4  ;;  %v1121_v8 = vsel %vm1120_vm8, %v1119_v22, %v1101_v16 }
 0x89d   :  { %v849_v29 = vadd.f32 %v847_v26, %v2196_v43 }
 0x89f   :  { %v855_v32 = vrot.slane %v849_v29, 5  ;;  %v850_v38 = vmul.f32 0.5, %v849_v29 }
 0x8a1   :  { %857 = vrot.lane.b32.xlu1 %v855_v32, %s2014_s23  ;;  %1869 = vtanh.f32 %v850_v38  ;;  %v1123_v32 = vsel %vm1122_vm9, %v1121_v8, %v1104_v20 }
 0x8a2   :  { %v1124_v18 = vsel %vm75_vm1, %v1123_v32, %v1107_v17 }
 0x8a5   :  { %865 = vrot.lane.b32.xlu1 %v863_v35, %s2013_s6 }
 0x8ab   :  { %v1870_v1 = vpop.eup %1869 }
 0x8ac   :  { %v852_v41 = vadd.f32 1.0, %v1870_v1 }
 0x8ae   :  { %v853_v25 = vmul.f32 0.5, %v852_v41 }
 0x90d   :  { %v868_v23 = vpop.permute.xlu0 %867 }
 0x90e   :  { %v870_v24 = vrot.slane %v868_v23, 3 }
 0x910   :  { %v872_v27 = vmul.f32 %v870_v24, %v853_v25 }
 0x912   :  { %v874_v31 = vrot.slane %v872_v27, 5 }
 0x913   :  { %v858_v28 = vpop.permute.xlu1 %857 }
 0x914   :  { %v859_v30 = vmul.f32 0.5, %v858_v28  ;;  %v1077_v28 = vrot.slane %v2196_v43, 7 }
 0x916   :  { %1871 = vtanh.f32 %v859_v30 }
 0x917   :  { %v866_v33 = vpop.permute.xlu1 %865 }
 0x918   :  { %v876_v34 = vadd.f32 %v874_v31, %v866_v33 }
 0x91a   :  { %1873 = vtanh.f32 %v876_v34 }
 0x920   :  { %v1872_v36 = vpop.eup %1871 }
 0x921   :  { %v861_v37 = vadd.f32 1.0, %v1872_v36 }
 0x923   :  { %v862_v39 = vmul.f32 0.5, %v861_v37 }
 0x924   :  { %v1874_v44 = vpop.eup %1873 }
 0x925   :  { %v878_v42 = vsub.f32 1.0, %v862_v39  ;;  %v880_v46 = vmul.f32 %v862_v39, %v775_v45 }
 0x927   :  { %v879_v48 = vmul.f32 %v1874_v44, %v878_v42 }
 0x929   :  { %v881_v50 = vadd.f32 %v880_v46, %v879_v48 }
 0x92b   :  { %1590 = vmatmul.mubr.msk.f32.vlgmr.msra.gmra.mrb[8].mxu1 %vm251_vm6, %v881_v50  ;;  %v882_v19 = vsel %vm251_vm6, %v881_v50, 0.0 }
 0x92c   :  { %v1110_v26 = vrot.slane %v882_v19, 3 }
 0x92e   :  { %v1126_v38 = vsel %vm1125_vm10, %v1124_v18, %v1110_v26 }
 0x9fe   :  { %v949_v51 = vpop.f32.mrb[8].mxu1 }
 0x9ff   :  { %v950_v52 = vadd.f32 %v949_v51, %v2203_v47  ;;  %v1591_v53 = vpop.f32.mrb[9].mxu1 }
 0xa01   :  { %v954_v54 = vrot.slane %v950_v52, 2  ;;  %974 = vrot.lane.b32.xlu1 %v950_v52, %s2013_s6 }
 0xa03   :  { %v956_v55 = vadd.f32 %v954_v54, %v2196_v43 }
 0xa05   :  { %v962_v56 = vrot.slane %v956_v55, 6  ;;  %v957_v58 = vmul.f32 0.5, %v956_v55 }
 0xa07   :  { %964 = vrot.lane.b32.xlu0 %v962_v56, %s2014_s23  ;;  %1875 = vtanh.f32 %v957_v58 }
 0xa0b   :  { %972 = vrot.lane.b32.xlu0 %v970_v57, %s2013_s6 }
 0xa11   :  { %v1876_v59 = vpop.eup %1875 }
 0xa12   :  { %v959_v60 = vadd.f32 1.0, %v1876_v59 }
 0xa14   :  { %v960_v63 = vmul.f32 0.5, %v959_v60 }
 0xa73   :  { %v975_v61 = vpop.permute.xlu1 %974 }
 0xa74   :  { %v977_v62 = vrot.slane %v975_v61, 2 }
 0xa76   :  { %v979_v0 = vmul.f32 %v977_v62, %v960_v63 }
 0xa78   :  { %v981_v4 = vrot.slane %v979_v0, 6 }
 0xa79   :  { %v965_v2 = vpop.permute.xlu0 %964 }
 0xa7a   :  { %v966_v3 = vmul.f32 0.5, %v965_v2 }
 0xa7c   :  { %1877 = vtanh.f32 %v966_v3 }
 0xa7d   :  { %v973_v5 = vpop.permute.xlu0 %972 }
 0xa7e   :  { %v983_v6 = vadd.f32 %v981_v4, %v973_v5 }
 0xa80   :  { %1879 = vtanh.f32 %v983_v6 }
 0xa86   :  { %v1878_v7 = vpop.eup %1877 }
 0xa87   :  { %v968_v9 = vadd.f32 1.0, %v1878_v7 }
 0xa89   :  { %v969_v11 = vmul.f32 0.5, %v968_v9 }
 0xa8a   :  { %v1880_v15 = vpop.eup %1879 }
 0xa8b   :  { %v985_v14 = vsub.f32 1.0, %v969_v11  ;;  %v987_v21 = vmul.f32 %v969_v11, %v882_v19 }
 0xa8d   :  { %v986_v10 = vmul.f32 %v1880_v15, %v985_v14 }
 0xa8f   :  { %v988_v29 = vadd.f32 %v987_v21, %v986_v10 }
 0xa91   :  { %1625 = vmatmul.mubr.msk.f32.vlgmr.msra.gmra.mrb[8].mxu0 %vm251_vm6, %v988_v29  ;;  %v989_v49 = vsel %vm251_vm6, %v988_v29, 0.0 }
 0xa92   :  { %v1113_v35 = vrot.slane %v989_v49, 2 }
 0xa94   :  { %v1128_v1 = vsel %vm1127_vm11, %v1126_v38, %v1113_v35 }
 0xb64   :  { %v1056_v41 = vpop.f32.mrb[8].mxu0 }
 0xb65   :  { %v1057_v40 = vadd.f32 %v1056_v41, %v2203_v47  ;;  %v1626_v23 = vpop.f32.mrb[9].mxu0 }
 0xb67   :  { %v1061_v24 = vrot.slane %v1057_v40, 1  ;;  %1081 = vrot.lane.b32.xlu0 %v1057_v40, %s2013_s6 }
 0xb69   :  { %v1063_v25 = vadd.f32 %v1061_v24, %v2196_v43 }
 0xb6b   :  { %v1069_v27 = vrot.slane %v1063_v25, 7  ;;  %v1064_v30 = vmul.f32 0.5, %v1063_v25 }
 0xb6d   :  { %1071 = vrot.lane.b32.xlu1 %v1069_v27, %s2014_s23  ;;  %1881 = vtanh.f32 %v1064_v30 }
 0xb71   :  { %1079 = vrot.lane.b32.xlu1 %v1077_v28, %s2013_s6 }
 0xb77   :  { %v1882_v31 = vpop.eup %1881 }
 0xb78   :  { %v1066_v33 = vadd.f32 1.0, %v1882_v31 }
 0xb7a   :  { %v1067_v47 = vmul.f32 0.5, %v1066_v33 }
 0xbd9   :  { %v1082_v34 = vpop.permute.xlu0 %1081 }
 0xbda   :  { %v1084_v36 = vrot.slane %v1082_v34, 1 }
 0xbdc   :  { %v1086_v37 = vmul.f32 %v1084_v36, %v1067_v47 }
 0xbde   :  { %v1088_v44 = vrot.slane %v1086_v37, 7 }
 0xbdf   :  { %v1072_v39 = vpop.permute.xlu1 %1071 }
 0xbe0   :  { %v1073_v42 = vmul.f32 0.5, %v1072_v39 }
 0xbe2   :  { %1883 = vtanh.f32 %v1073_v42 }
 0xbe3   :  { %v1080_v45 = vpop.permute.xlu1 %1079 }
 0xbe4   :  { %v1090_v46 = vadd.f32 %v1088_v44, %v1080_v45 }
 0xbe6   :  { %1885 = vtanh.f32 %v1090_v46 }
 0xbec   :  { %v1884_v48 = vpop.eup %1883 }
 0xbed   :  { %v1075_v50 = vadd.f32 1.0, %v1884_v48 }
 0xbef   :  { %v1076_v43 = vmul.f32 0.5, %v1075_v50 }
 0xbf0   :  { %v1886_v52 = vpop.eup %1885 }
 0xbf1   :  { %v1092_v51 = vsub.f32 1.0, %v1076_v43  ;;  %v1094_v53 = vmul.f32 %v1076_v43, %v989_v49 }
 0xbf3   :  { %v1093_v54 = vmul.f32 %v1886_v52, %v1092_v51 }
 0xbf5   :  { %v1095_v55 = vadd.f32 %v1094_v53, %v1093_v54 }
 0xbf7   :  { %v1096_v56 = vsel %vm251_vm6, %v1095_v55, 0.0 }
 0xbf8   :  { %v1116_v57 = vrot.slane %v1096_v56, 1  ;;  %1132 = vst [vmem:[#allocation9] sm:$0x1] %v1096_v56 }
 0xbf9   :  { %1942 = shalt.err (!%p1939_p6)
}
 0xbfa   :  { %s1943_s2 = scalar_lea.hbm %s2446_s8, 16 }
 0xbfb   :  { %p1944_p7 = scmp.ne.s32.totalorder %s2446_s8, %s1943_s2  ;;  %p1947_p8 = scmp.lt.u32.totalorder %s1943_s2, %s2446_s8 }
 0xbfd   :  { %p1949_p9 = pnand %p1947_p8, %p1944_p7 }
 0xbff   :  { %1952 = shalt.err (!%p1949_p9)
}
 0xc00   :  { %1152 = dma.vmem_to_hbm [thread:$0]  %s1150_s24, 16, %s2446_s8, [#allocation10]   ;;  %v1130_v13 = vsel %vm1129_vm12, %v1128_v1, %v1116_v57 }
 0xc01   :  { %s1953_s17 = scalar_lea.vmem %s2387_s26, 128  ;;  %p1958_p11 = scmp.lt.s32.totalorder %s2387_s26, %s2387_s26 }
 0xc02   :  { %p1954_p10 = scmp.ne.s32.totalorder %s2387_s26, %s1953_s17  ;;  %p1959_p12 = scmp.lt.s32.totalorder %s1953_s17, %s1953_s17 }
 0xc04   :  { %p1960_p13 = por %p1959_p12, %p1958_p11 }
 0xc06   :  { %p1961_p0 = pnand %p1960_p13, %p1954_p10 }
 0xc08   :  { %1964 = shalt.err (!%p1961_p0)
}
 0xc09   :  { %s1965_s0 = scalar_lea.hbm %s2447_s9, 128 }
 0xc0a   :  { %p1966_p1 = scmp.ne.s32.totalorder %s2447_s9, %s1965_s0  ;;  %p1969_p2 = scmp.lt.u32.totalorder %s1965_s0, %s2447_s9 }
 0xc0c   :  { %p1971_p3 = pnand %p1969_p2, %p1966_p1 }
 0xc0e   :  { %1974 = shalt.err (!%p1971_p3)
}
 0xc0f   :  { %1162 = dma.vmem_to_hbm [thread:$0]  %s2387_s26, 128, %s2447_s9, [#allocation10]   ;;  %1131 = vst [vmem:[#allocation8] sm:$0xff] %v1130_v13 }
 0xc10   :  { %s1975_s22 = scalar_lea.vmem %s2389_s28, 128  ;;  %p1980_p5 = scmp.lt.s32.totalorder %s2389_s28, %s2389_s28 }
 0xc11   :  { %p1976_p4 = scmp.ne.s32.totalorder %s2389_s28, %s1975_s22  ;;  %p1981_p6 = scmp.lt.s32.totalorder %s1975_s22, %s1975_s22 }
 0xc13   :  { %p1982_p7 = por %p1981_p6, %p1980_p5 }
 0xc15   :  { %p1983_p8 = pnand %p1982_p7, %p1976_p4 }
 0xc17   :  { %1986 = shalt.err (!%p1983_p8)
}
 0xc18   :  { %s1987_s24 = scalar_lea.hbm %s2445_s7, 128 }
 0xc19   :  { %p1988_p9 = scmp.ne.s32.totalorder %s2445_s7, %s1987_s24  ;;  %p1991_p10 = scmp.lt.u32.totalorder %s1987_s24, %s2445_s7 }
 0xc1b   :  { %p1993_p11 = pnand %p1991_p10, %p1988_p9 }
 0xc1d   :  { %1996 = shalt.err (!%p1993_p11)
}
 0xc1e   :  { %1142 = dma.vmem_to_hbm [thread:$0]  %s2389_s28, 128, %s2445_s7, [#allocation5]  }
 0xc1f   :  { %2001 = dma.done.wait [#allocation5], 128  }
 0xc20   :  { %2002 = vsyncadd [#allocation5], 4294967168 }
 0xc21   :  { %2003 = dma.done.wait [#allocation10], 144  }
 0xc22   :  { %2004 = vsyncadd [#allocation10], 4294967152 }
 0xc23   :  { %1172 = vsyncpa [#allocation4], 1 }
 0xc24   :  { %1173 = vsyncpa [#allocation7], 1 }
 0xc25   :  { %1174 = vsyncpa [#allocation5], 1 }
 0xc26   :  { %1175 = vsyncpa [#allocation10], 1 }

</bundles_post_ra>
